<compile_context>
chip_gen: v5e
topology: v5e:2x2
jax: 0.10.0
libtpu: 0.0.40
codegen_flags: <defaults>
</compile_context>

<pallas_src>
import numpy as np
import jax
import jax.numpy as jnp
from jax import lax
from jax.experimental import pallas as pl
from jax.experimental.pallas import tpu as pltpu

# -----------------------------------------------------------------------------
# Hyper-parameters (small demo sizes consistent with S4Model's forward)
# -----------------------------------------------------------------------------
B = 2             # batch
L = 16            # sequence length
H = 32            # model width (d_model)
N = 8             # SSM state size (N/2 complex modes per channel)
VOCAB = 64        # toy vocab (original padding_idx=28439 is out of range here)
OUT_DIM = 10      # output_dim
OUT_PAD = 128     # lane-dense padded head width
N_LAYERS = 2
LN_EPS = 1e-5     # PyTorch nn.LayerNorm default
BL = B * L        # 32 rows, one per (batch, position)

TAPS_PER_GROUP = 4
N_GROUPS = L // TAPS_PER_GROUP       # 4 groups of 4 conv taps
GROUP_ROWS = TAPS_PER_GROUP * BL     # 128 rows of the unfold matrix per group


# -----------------------------------------------------------------------------
# Pallas kernel: [S4D conv + LayerNorm + MLP + residual] x N_LAYERS -> head
# Activations stay in the per-position (B*L, H) layout for the whole kernel.
# -----------------------------------------------------------------------------
def s4_model_kernel(x_ref, s_ref, ks_ref, w1_ref, b1_ref, w2_ref, b2_ref,
                    wout_ref, bout_ref, out_ref):
    x = x_ref[...]                                   # (BL, H) f32 residual stream

    for ell in range(N_LAYERS):                      # static unroll (2 layers)
        u = x
        u_bf = u.astype(jnp.bfloat16)
        # ---- S4D layer: causal depthwise conv.  The shared 0/1 unfold matrix
        #      produces the L causally-shifted copies of u (4 taps per MXU
        #      matmul); per-(tap, channel) scales -- with the D*u skip folded
        #      into tap 0 offline -- are applied on the VPU and summed in f32.
        # TODO(synk): S4DLayer source not provided; standard S4D diagonal SSM
        #             (ZOH discretization) assumed, conv kernel built offline.
        y = jnp.zeros((BL, H), jnp.float32)
        kbase = ell * L * BL
        for g in range(N_GROUPS):
            r0 = g * GROUP_ROWS
            yg = jnp.dot(s_ref[r0:r0 + GROUP_ROWS, :], u_bf,
                         preferred_element_type=jnp.float32)        # (128, H)
            yg = yg * ks_ref[kbase + r0:kbase + r0 + GROUP_ROWS, :]
            for t in range(TAPS_PER_GROUP):
                y = y + yg[t * BL:(t + 1) * BL, :]
        # ---- LayerNorm over H per (b, l) row, statistics fully in f32.
        #      (gamma/beta folded into W1/b1 offline.)
        mu = jnp.mean(y, axis=-1, keepdims=True)
        d = y - mu
        var = jnp.mean(d * d, axis=-1, keepdims=True)
        zn = d * lax.rsqrt(var + LN_EPS)
        # ---- MLP: Linear -> ReLU -> Linear -> ReLU (Dropout == identity, eval)
        z = jnp.maximum(
            jnp.dot(zn.astype(jnp.bfloat16), w1_ref[ell * H:(ell + 1) * H, :],
                    preferred_element_type=jnp.float32)
            + b1_ref[ell:ell + 1, :], 0.0)
        z = jnp.maximum(
            jnp.dot(z.astype(jnp.bfloat16), w2_ref[ell * H:(ell + 1) * H, :],
                    preferred_element_type=jnp.float32)
            + b2_ref[ell:ell + 1, :], 0.0)
        # ---- residual -------------------------------------------------------
        x = x + z

    # ---- output head: real (H, 128) padded weight -> lane-dense (BL, 128) store
    out_ref[...] = (jnp.dot(x.astype(jnp.bfloat16), wout_ref[...],
                            preferred_element_type=jnp.float32) + bout_ref[...])


def s4_model_forward(tokens, kp):
    # Embedding gather (data-dependent) + PE add stay in XLA glue; the result is
    # pre-arranged into the kernel's (B*L, H) operand.
    x_in = (jnp.take(kp["emb"], tokens, axis=0) + kp["pe"][None]).reshape(BL, H)
    args = (x_in, kp["s_stack"], kp["ks"], kp["w1"], kp["b1"], kp["w2"],
            kp["b2"], kp["wout"], kp["bout"])
    vmem = pl.BlockSpec(memory_space=pltpu.MemorySpace.VMEM)
    out = pl.pallas_call(
        s4_model_kernel,
        out_shape=jax.ShapeDtypeStruct((BL, OUT_PAD), jnp.float32),
        in_specs=[vmem] * len(args),
        out_specs=vmem,
    )(*args)
    return out.reshape(B, L, OUT_PAD)[:, :, :OUT_DIM]


# -----------------------------------------------------------------------------
# Deterministic parameter setup (host/numpy glue for the complex S4D kernel)
# -----------------------------------------------------------------------------
def _s4d_conv_kernel_np(log_dt, log_A_real, A_imag, C, length):
    dt = np.exp(log_dt)                                      # (H,)
    A = -np.exp(log_A_real) + 1j * A_imag                    # (H, N/2)
    dtA = A * dt[:, None]
    Ct = C * (np.exp(dtA) - 1.0) / A                         # (H, N/2)
    V = np.exp(dtA[:, :, None] * np.arange(length))          # (H, N/2, L)
    K = 2.0 * np.einsum("hn,hnl->hl", Ct, V).real            # (H, L)
    return K.astype(np.float32)


def _toeplitz_np(K):
    # T[l, m, h] = K[h, l - m] for l >= m else 0  (used by the f32 reference)
    li = np.arange(L)[:, None]
    mi = np.arange(L)[None, :]
    diff = li - mi
    T = np.where(diff[None] >= 0,
                 np.take(K, np.clip(diff, 0, L - 1), axis=1), 0.0)   # (H, L, L)
    return np.transpose(T, (1, 2, 0)).astype(np.float32)             # (L, L, H)


def init_params(key):
    n2 = N // 2
    k_emb, k_layers, k_out = jax.random.split(key, 3)
    emb = jax.random.normal(k_emb, (VOCAB, H), jnp.float32)
    # TODO(synk): padding_idx=28439 >= toy vocab, so padding-row zeroing is a no-op.

    # sinusoidal positional encoding
    pos = np.arange(L, dtype=np.float32)[:, None]
    div = np.exp(np.arange(0, H, 2, dtype=np.float32) * (-np.log(10000.0) / H))
    pe = np.zeros((L, H), np.float32)
    pe[:, 0::2] = np.sin(pos * div)
    pe[:, 1::2] = np.cos(pos * div)

    kconv, toep, dvec, ln_g, ln_b, w1, b1, w2, b2 = ([] for _ in range(9))
    bound = 1.0 / np.sqrt(H)
    for lk in jax.random.split(k_layers, N_LAYERS):
        ks = jax.random.split(lk, 10)
        log_dt = (np.asarray(jax.random.uniform(ks[0], (H,), jnp.float32))
                  * (np.log(0.1) - np.log(0.001)) + np.log(0.001))
        log_A_real = np.log(0.5 * np.ones((H, n2), np.float32))
        A_imag = np.pi * np.broadcast_to(np.arange(n2, dtype=np.float32), (H, n2))
        C = ((np.asarray(jax.random.normal(ks[1], (H, n2), jnp.float32))
              + 1j * np.asarray(jax.random.normal(ks[2], (H, n2), jnp.float32)))
             * (0.5 ** 0.5))
        Kc = _s4d_conv_kernel_np(log_dt, log_A_real, A_imag, C, L)
        kconv.append(Kc)
        toep.append(_toeplitz_np(Kc))
        dvec.append(np.asarray(jax.random.normal(ks[3], (H,), jnp.float32))[None, :])
        # LN affine params perturbed from torch's ones/zeros init so the offline
        # gamma/beta fold into w1/b1 is actually exercised by the check.
        ln_g.append(1.0 + 0.1 * np.asarray(jax.random.normal(ks[8], (H,), jnp.float32))[None, :])
        ln_b.append(0.1 * np.asarray(jax.random.normal(ks[9], (H,), jnp.float32))[None, :])
        # weights stored as (in, out) == transpose of nn.Linear.weight
        w1.append(np.asarray(jax.random.uniform(ks[4], (H, H), jnp.float32, -bound, bound)))
        b1.append(np.asarray(jax.random.uniform(ks[5], (H,), jnp.float32, -bound, bound))[None, :])
        w2.append(np.asarray(jax.random.uniform(ks[6], (H, H), jnp.float32, -bound, bound)))
        b2.append(np.asarray(jax.random.uniform(ks[7], (H,), jnp.float32, -bound, bound))[None, :])

    kw, kb = jax.random.split(k_out)
    wout = jax.random.uniform(kw, (H, OUT_DIM), jnp.float32, -bound, bound)
    bout = jax.random.uniform(kb, (1, OUT_DIM), jnp.float32, -bound, bound)

    stack = lambda xs: jnp.asarray(np.stack(xs, axis=0))
    return dict(emb=emb, pe=jnp.asarray(pe),
                kconv=stack(kconv), toep=stack(toep), dvec=stack(dvec),
                ln_g=stack(ln_g), ln_b=stack(ln_b),
                w1=stack(w1), b1=stack(b1), w2=stack(w2), b2=stack(b2),
                wout=wout, bout=bout)


def pack_kernel_params(p):
    """Offline constant folds: shared causal shift/unfold matrix, per-layer tap
    scales with the D skip folded into tap 0, LN gamma/beta folded into W1/b1,
    bf16 weight casts, lane-padded output head."""
    # Shift/unfold matrix: S[j*BL + r, m] = 1 iff m == r - j and (r mod L) >= j
    # (within-batch-block causal shift by j positions).  Layer-independent.
    r = np.arange(BL)
    S = np.zeros((L, BL, BL), np.float32)
    for j in range(L):
        rows = r[(r % L) >= j]
        S[j, rows, rows - j] = 1.0
    s_stack = S.reshape(L * BL, BL)                                  # (512, 32)

    # Per-layer tap scales pre-broadcast over the (b, l) rows; D folded into tap 0.
    kconv = np.asarray(p["kconv"])                                   # (NL, H, L)
    dvec = np.asarray(p["dvec"])[:, 0, :]                            # (NL, H)
    ks_blocks = []
    for ell in range(N_LAYERS):
        kd = kconv[ell].copy()                                       # (H, L)
        kd[:, 0] += dvec[ell]                                        # fold D skip
        ks_blocks.append(
            np.repeat(kd.T[:, None, :], BL, axis=1).reshape(L * BL, H))
    ks = np.concatenate(ks_blocks, axis=0)                           # (NL*512, 32)

    # LayerNorm affine folded into W1 / b1:  (zn*g + b) @ W1 + b1
    ln_g = np.asarray(p["ln_g"])[:, 0, :]
    ln_b = np.asarray(p["ln_b"])[:, 0, :]
    w1 = np.asarray(p["w1"]); b1 = np.asarray(p["b1"])[:, 0, :]
    w2 = np.asarray(p["w2"]); b2 = np.asarray(p["b2"])[:, 0, :]
    w1f = ln_g[:, :, None] * w1                                      # diag(gamma) @ W1
    b1f = b1 + np.einsum("eh,ehk->ek", ln_b, w1)                     # beta @ W1 + b1

    # Lane-dense output head: pad to 128 columns (wrapper slices back to 10).
    wout = np.asarray(p["wout"]); bout = np.asarray(p["bout"])
    wout_pad = np.zeros((H, OUT_PAD), np.float32); wout_pad[:, :OUT_DIM] = wout
    bout_pad = np.zeros((1, OUT_PAD), np.float32); bout_pad[:, :OUT_DIM] = bout

    bf = lambda a: jnp.asarray(a, jnp.bfloat16)
    f32 = lambda a: jnp.asarray(a, jnp.float32)
    return dict(emb=p["emb"], pe=p["pe"],
                s_stack=bf(s_stack), ks=f32(ks),
                w1=bf(w1f.reshape(N_LAYERS * H, H)), b1=f32(b1f),
                w2=bf(w2.reshape(N_LAYERS * H, H)), b2=f32(b2),
                wout=bf(wout_pad), bout=f32(bout_pad))


# -----------------------------------------------------------------------------
# Pure-JAX f32 reference for verification (unfused, torch-like formulation)
# -----------------------------------------------------------------------------
def reference_forward(tokens, p):
    hi = lax.Precision.HIGHEST
    x = jnp.take(p["emb"], tokens, axis=0) + p["pe"][None]
    for ell in range(N_LAYERS):
        u = x
        y = jnp.einsum("lmh,bmh->blh", p["toep"][ell], u,
                       precision=hi) + p["dvec"][ell][None] * u
        mu = y.mean(-1, keepdims=True)
        var = ((y - mu) ** 2).mean(-1, keepdims=True)
        z = (y - mu) * lax.rsqrt(var + LN_EPS) * p["ln_g"][ell] + p["ln_b"][ell]
        z = jnp.maximum(jnp.einsum("blh,hk->blk", z, p["w1"][ell],
                                   precision=hi) + p["b1"][ell], 0.0)
        z = jnp.maximum(jnp.einsum("blh,hk->blk", z, p["w2"][ell],
                                   precision=hi) + p["b2"][ell], 0.0)
        x = x + z
    return jnp.einsum("blh,hk->blk", x, p["wout"], precision=hi) + p["bout"]


if __name__ == "__main__":
    root = jax.random.PRNGKey(0)
    k_params, k_tokens = jax.random.split(root)
    params = init_params(k_params)
    kparams = pack_kernel_params(params)
    tokens = jax.random.randint(k_tokens, (B, L), 0, VOCAB)

    out = jax.block_until_ready(s4_model_forward(tokens, kparams))
    ref = jax.block_until_ready(reference_forward(tokens, params))

    assert out.shape == (B, L, OUT_DIM) and out.dtype == jnp.float32
    np.testing.assert_allclose(np.asarray(out), np.asarray(ref), rtol=2e-2, atol=2e-2)
    print("KERNEL_OK")
</pallas_src>

<mosaic_0001>
module attributes {stable_mosaic.version = 11 : i64} {
  func.func @s4_model_kernel(%arg0: memref<32x32xf32, #tpu.memory_space<vmem>>, %arg1: memref<512x32xbf16, #tpu.memory_space<vmem>>, %arg2: memref<1024x32xf32, #tpu.memory_space<vmem>>, %arg3: memref<64x32xbf16, #tpu.memory_space<vmem>>, %arg4: memref<2x32xf32, #tpu.memory_space<vmem>>, %arg5: memref<64x32xbf16, #tpu.memory_space<vmem>>, %arg6: memref<2x32xf32, #tpu.memory_space<vmem>>, %arg7: memref<32x128xbf16, #tpu.memory_space<vmem>>, %arg8: memref<1x128xf32, #tpu.memory_space<vmem>>, %arg9: memref<32x128xf32, #tpu.memory_space<vmem>>) attributes {dimension_semantics = [], scalar_prefetch = 0 : i64, scratch_operands = 0 : i64, tpu.core_type = #tpu.core_type<tc>} {
    %c0 = arith.constant 0 : index
    %c0_0 = arith.constant 0 : index
    %0 = vector.load %arg0[%c0, %c0_0] : memref<32x32xf32, #tpu.memory_space<vmem>>, vector<32x32xf32>
    %1 = arith.truncf %0 : vector<32x32xf32> to vector<32x32xbf16>
    %cst = arith.constant 0.000000e+00 : f32
    %2 = vector.broadcast %cst : f32 to vector<32x32xf32>
    %c0_1 = arith.constant 0 : index
    %c0_2 = arith.constant 0 : index
    %3 = vector.load %arg1[%c0_1, %c0_2] : memref<512x32xbf16, #tpu.memory_space<vmem>>, vector<128x32xbf16>
    %cst_3 = arith.constant dense<0.000000e+00> : vector<128x32xf32>
    %4 = tpu.matmul %3, %1, %cst_3 {dimension_numbers = #tpu.dot_dimension_numbers<[1], [0], [0], [1], [0, 0, 1, 1], [], []>} : vector<128x32xbf16>, vector<32x32xbf16>, vector<128x32xf32> -> vector<128x32xf32>
    %c0_4 = arith.constant 0 : index
    %c0_5 = arith.constant 0 : index
    %5 = vector.load %arg2[%c0_4, %c0_5] : memref<1024x32xf32, #tpu.memory_space<vmem>>, vector<128x32xf32>
    %6 = arith.mulf %4, %5 : vector<128x32xf32>
    %7 = vector.extract_strided_slice %6 {offsets = [0, 0], sizes = [32, 32], strides = [1, 1]} : vector<128x32xf32> to vector<32x32xf32>
    %8 = arith.addf %2, %7 : vector<32x32xf32>
    %9 = vector.extract_strided_slice %6 {offsets = [32, 0], sizes = [32, 32], strides = [1, 1]} : vector<128x32xf32> to vector<32x32xf32>
    %10 = arith.addf %8, %9 : vector<32x32xf32>
    %11 = vector.extract_strided_slice %6 {offsets = [64, 0], sizes = [32, 32], strides = [1, 1]} : vector<128x32xf32> to vector<32x32xf32>
    %12 = arith.addf %10, %11 : vector<32x32xf32>
    %13 = vector.extract_strided_slice %6 {offsets = [96, 0], sizes = [32, 32], strides = [1, 1]} : vector<128x32xf32> to vector<32x32xf32>
    %14 = arith.addf %12, %13 : vector<32x32xf32>
    %c128 = arith.constant 128 : index
    %c0_6 = arith.constant 0 : index
    %15 = vector.load %arg1[%c128, %c0_6] : memref<512x32xbf16, #tpu.memory_space<vmem>>, vector<128x32xbf16>
    %cst_7 = arith.constant dense<0.000000e+00> : vector<128x32xf32>
    %16 = tpu.matmul %15, %1, %cst_7 {dimension_numbers = #tpu.dot_dimension_numbers<[1], [0], [0], [1], [0, 0, 1, 1], [], []>} : vector<128x32xbf16>, vector<32x32xbf16>, vector<128x32xf32> -> vector<128x32xf32>
    %c128_8 = arith.constant 128 : index
    %c0_9 = arith.constant 0 : index
    %17 = vector.load %arg2[%c128_8, %c0_9] : memref<1024x32xf32, #tpu.memory_space<vmem>>, vector<128x32xf32>
    %18 = arith.mulf %16, %17 : vector<128x32xf32>
    %19 = vector.extract_strided_slice %18 {offsets = [0, 0], sizes = [32, 32], strides = [1, 1]} : vector<128x32xf32> to vector<32x32xf32>
    %20 = arith.addf %14, %19 : vector<32x32xf32>
    %21 = vector.extract_strided_slice %18 {offsets = [32, 0], sizes = [32, 32], strides = [1, 1]} : vector<128x32xf32> to vector<32x32xf32>
    %22 = arith.addf %20, %21 : vector<32x32xf32>
    %23 = vector.extract_strided_slice %18 {offsets = [64, 0], sizes = [32, 32], strides = [1, 1]} : vector<128x32xf32> to vector<32x32xf32>
    %24 = arith.addf %22, %23 : vector<32x32xf32>
    %25 = vector.extract_strided_slice %18 {offsets = [96, 0], sizes = [32, 32], strides = [1, 1]} : vector<128x32xf32> to vector<32x32xf32>
    %26 = arith.addf %24, %25 : vector<32x32xf32>
    %c256 = arith.constant 256 : index
    %c0_10 = arith.constant 0 : index
    %27 = vector.load %arg1[%c256, %c0_10] : memref<512x32xbf16, #tpu.memory_space<vmem>>, vector<128x32xbf16>
    %cst_11 = arith.constant dense<0.000000e+00> : vector<128x32xf32>
    %28 = tpu.matmul %27, %1, %cst_11 {dimension_numbers = #tpu.dot_dimension_numbers<[1], [0], [0], [1], [0, 0, 1, 1], [], []>} : vector<128x32xbf16>, vector<32x32xbf16>, vector<128x32xf32> -> vector<128x32xf32>
    %c256_12 = arith.constant 256 : index
    %c0_13 = arith.constant 0 : index
    %29 = vector.load %arg2[%c256_12, %c0_13] : memref<1024x32xf32, #tpu.memory_space<vmem>>, vector<128x32xf32>
    %30 = arith.mulf %28, %29 : vector<128x32xf32>
    %31 = vector.extract_strided_slice %30 {offsets = [0, 0], sizes = [32, 32], strides = [1, 1]} : vector<128x32xf32> to vector<32x32xf32>
    %32 = arith.addf %26, %31 : vector<32x32xf32>
    %33 = vector.extract_strided_slice %30 {offsets = [32, 0], sizes = [32, 32], strides = [1, 1]} : vector<128x32xf32> to vector<32x32xf32>
    %34 = arith.addf %32, %33 : vector<32x32xf32>
    %35 = vector.extract_strided_slice %30 {offsets = [64, 0], sizes = [32, 32], strides = [1, 1]} : vector<128x32xf32> to vector<32x32xf32>
    %36 = arith.addf %34, %35 : vector<32x32xf32>
    %37 = vector.extract_strided_slice %30 {offsets = [96, 0], sizes = [32, 32], strides = [1, 1]} : vector<128x32xf32> to vector<32x32xf32>
    %38 = arith.addf %36, %37 : vector<32x32xf32>
    %c384 = arith.constant 384 : index
    %c0_14 = arith.constant 0 : index
    %39 = vector.load %arg1[%c384, %c0_14] : memref<512x32xbf16, #tpu.memory_space<vmem>>, vector<128x32xbf16>
    %cst_15 = arith.constant dense<0.000000e+00> : vector<128x32xf32>
    %40 = tpu.matmul %39, %1, %cst_15 {dimension_numbers = #tpu.dot_dimension_numbers<[1], [0], [0], [1], [0, 0, 1, 1], [], []>} : vector<128x32xbf16>, vector<32x32xbf16>, vector<128x32xf32> -> vector<128x32xf32>
    %c384_16 = arith.constant 384 : index
    %c0_17 = arith.constant 0 : index
    %41 = vector.load %arg2[%c384_16, %c0_17] : memref<1024x32xf32, #tpu.memory_space<vmem>>, vector<128x32xf32>
    %42 = arith.mulf %40, %41 : vector<128x32xf32>
    %43 = vector.extract_strided_slice %42 {offsets = [0, 0], sizes = [32, 32], strides = [1, 1]} : vector<128x32xf32> to vector<32x32xf32>
    %44 = arith.addf %38, %43 : vector<32x32xf32>
    %45 = vector.extract_strided_slice %42 {offsets = [32, 0], sizes = [32, 32], strides = [1, 1]} : vector<128x32xf32> to vector<32x32xf32>
    %46 = arith.addf %44, %45 : vector<32x32xf32>
    %47 = vector.extract_strided_slice %42 {offsets = [64, 0], sizes = [32, 32], strides = [1, 1]} : vector<128x32xf32> to vector<32x32xf32>
    %48 = arith.addf %46, %47 : vector<32x32xf32>
    %49 = vector.extract_strided_slice %42 {offsets = [96, 0], sizes = [32, 32], strides = [1, 1]} : vector<128x32xf32> to vector<32x32xf32>
    %50 = arith.addf %48, %49 : vector<32x32xf32>
    %cst_18 = arith.constant dense<0.000000e+00> : vector<32xf32>
    %51 = vector.multi_reduction <add>, %50, %cst_18 [1] : vector<32x32xf32> to vector<32xf32>
    %52 = vector.shape_cast %51 : vector<32xf32> to vector<32x1xf32>
    %cst_19 = arith.constant 3.200000e+01 : f32
    %53 = vector.broadcast %cst_19 : f32 to vector<32x1xf32>
    %54 = arith.divf %52, %53 : vector<32x1xf32>
    %55 = vector.broadcast %54 : vector<32x1xf32> to vector<32x32xf32>
    %56 = arith.subf %50, %55 : vector<32x32xf32>
    %57 = arith.mulf %56, %56 : vector<32x32xf32>
    %cst_20 = arith.constant dense<0.000000e+00> : vector<32xf32>
    %58 = vector.multi_reduction <add>, %57, %cst_20 [1] : vector<32x32xf32> to vector<32xf32>
    %59 = vector.shape_cast %58 : vector<32xf32> to vector<32x1xf32>
    %cst_21 = arith.constant 3.200000e+01 : f32
    %60 = vector.broadcast %cst_21 : f32 to vector<32x1xf32>
    %61 = arith.divf %59, %60 : vector<32x1xf32>
    %cst_22 = arith.constant 9.99999974E-6 : f32
    %62 = vector.broadcast %cst_22 : f32 to vector<32x1xf32>
    %63 = arith.addf %61, %62 : vector<32x1xf32>
    %64 = math.rsqrt %63 : vector<32x1xf32>
    %65 = vector.broadcast %64 : vector<32x1xf32> to vector<32x32xf32>
    %66 = arith.mulf %56, %65 : vector<32x32xf32>
    %67 = arith.truncf %66 : vector<32x32xf32> to vector<32x32xbf16>
    %c0_23 = arith.constant 0 : index
    %c0_24 = arith.constant 0 : index
    %68 = vector.load %arg3[%c0_23, %c0_24] : memref<64x32xbf16, #tpu.memory_space<vmem>>, vector<32x32xbf16>
    %cst_25 = arith.constant dense<0.000000e+00> : vector<32x32xf32>
    %69 = tpu.matmul %67, %68, %cst_25 {dimension_numbers = #tpu.dot_dimension_numbers<[1], [0], [0], [1], [0, 0, 1, 1], [], []>} : vector<32x32xbf16>, vector<32x32xbf16>, vector<32x32xf32> -> vector<32x32xf32>
    %c0_26 = arith.constant 0 : index
    %c0_27 = arith.constant 0 : index
    %70 = vector.load %arg4[%c0_26, %c0_27] : memref<2x32xf32, #tpu.memory_space<vmem>>, vector<1x32xf32>
    %71 = vector.broadcast %70 : vector<1x32xf32> to vector<32x32xf32>
    %72 = arith.addf %69, %71 : vector<32x32xf32>
    %cst_28 = arith.constant 0.000000e+00 : f32
    %73 = vector.broadcast %cst_28 : f32 to vector<32x32xf32>
    %74 = arith.maximumf %72, %73 : vector<32x32xf32>
    %75 = arith.truncf %74 : vector<32x32xf32> to vector<32x32xbf16>
    %c0_29 = arith.constant 0 : index
    %c0_30 = arith.constant 0 : index
    %76 = vector.load %arg5[%c0_29, %c0_30] : memref<64x32xbf16, #tpu.memory_space<vmem>>, vector<32x32xbf16>
    %cst_31 = arith.constant dense<0.000000e+00> : vector<32x32xf32>
    %77 = tpu.matmul %75, %76, %cst_31 {dimension_numbers = #tpu.dot_dimension_numbers<[1], [0], [0], [1], [0, 0, 1, 1], [], []>} : vector<32x32xbf16>, vector<32x32xbf16>, vector<32x32xf32> -> vector<32x32xf32>
    %c0_32 = arith.constant 0 : index
    %c0_33 = arith.constant 0 : index
    %78 = vector.load %arg6[%c0_32, %c0_33] : memref<2x32xf32, #tpu.memory_space<vmem>>, vector<1x32xf32>
    %79 = vector.broadcast %78 : vector<1x32xf32> to vector<32x32xf32>
    %80 = arith.addf %77, %79 : vector<32x32xf32>
    %cst_34 = arith.constant 0.000000e+00 : f32
    %81 = vector.broadcast %cst_34 : f32 to vector<32x32xf32>
    %82 = arith.maximumf %80, %81 : vector<32x32xf32>
    %83 = arith.addf %0, %82 : vector<32x32xf32>
    %84 = arith.truncf %83 : vector<32x32xf32> to vector<32x32xbf16>
    %cst_35 = arith.constant 0.000000e+00 : f32
    %85 = vector.broadcast %cst_35 : f32 to vector<32x32xf32>
    %c0_36 = arith.constant 0 : index
    %c0_37 = arith.constant 0 : index
    %86 = vector.load %arg1[%c0_36, %c0_37] : memref<512x32xbf16, #tpu.memory_space<vmem>>, vector<128x32xbf16>
    %cst_38 = arith.constant dense<0.000000e+00> : vector<128x32xf32>
    %87 = tpu.matmul %86, %84, %cst_38 {dimension_numbers = #tpu.dot_dimension_numbers<[1], [0], [0], [1], [0, 0, 1, 1], [], []>} : vector<128x32xbf16>, vector<32x32xbf16>, vector<128x32xf32> -> vector<128x32xf32>
    %c512 = arith.constant 512 : index
    %c0_39 = arith.constant 0 : index
    %88 = vector.load %arg2[%c512, %c0_39] : memref<1024x32xf32, #tpu.memory_space<vmem>>, vector<128x32xf32>
    %89 = arith.mulf %87, %88 : vector<128x32xf32>
    %90 = vector.extract_strided_slice %89 {offsets = [0, 0], sizes = [32, 32], strides = [1, 1]} : vector<128x32xf32> to vector<32x32xf32>
    %91 = arith.addf %85, %90 : vector<32x32xf32>
    %92 = vector.extract_strided_slice %89 {offsets = [32, 0], sizes = [32, 32], strides = [1, 1]} : vector<128x32xf32> to vector<32x32xf32>
    %93 = arith.addf %91, %92 : vector<32x32xf32>
    %94 = vector.extract_strided_slice %89 {offsets = [64, 0], sizes = [32, 32], strides = [1, 1]} : vector<128x32xf32> to vector<32x32xf32>
    %95 = arith.addf %93, %94 : vector<32x32xf32>
    %96 = vector.extract_strided_slice %89 {offsets = [96, 0], sizes = [32, 32], strides = [1, 1]} : vector<128x32xf32> to vector<32x32xf32>
    %97 = arith.addf %95, %96 : vector<32x32xf32>
    %c128_40 = arith.constant 128 : index
    %c0_41 = arith.constant 0 : index
    %98 = vector.load %arg1[%c128_40, %c0_41] : memref<512x32xbf16, #tpu.memory_space<vmem>>, vector<128x32xbf16>
    %cst_42 = arith.constant dense<0.000000e+00> : vector<128x32xf32>
    %99 = tpu.matmul %98, %84, %cst_42 {dimension_numbers = #tpu.dot_dimension_numbers<[1], [0], [0], [1], [0, 0, 1, 1], [], []>} : vector<128x32xbf16>, vector<32x32xbf16>, vector<128x32xf32> -> vector<128x32xf32>
    %c640 = arith.constant 640 : index
    %c0_43 = arith.constant 0 : index
    %100 = vector.load %arg2[%c640, %c0_43] : memref<1024x32xf32, #tpu.memory_space<vmem>>, vector<128x32xf32>
    %101 = arith.mulf %99, %100 : vector<128x32xf32>
    %102 = vector.extract_strided_slice %101 {offsets = [0, 0], sizes = [32, 32], strides = [1, 1]} : vector<128x32xf32> to vector<32x32xf32>
    %103 = arith.addf %97, %102 : vector<32x32xf32>
    %104 = vector.extract_strided_slice %101 {offsets = [32, 0], sizes = [32, 32], strides = [1, 1]} : vector<128x32xf32> to vector<32x32xf32>
    %105 = arith.addf %103, %104 : vector<32x32xf32>
    %106 = vector.extract_strided_slice %101 {offsets = [64, 0], sizes = [32, 32], strides = [1, 1]} : vector<128x32xf32> to vector<32x32xf32>
    %107 = arith.addf %105, %106 : vector<32x32xf32>
    %108 = vector.extract_strided_slice %101 {offsets = [96, 0], sizes = [32, 32], strides = [1, 1]} : vector<128x32xf32> to vector<32x32xf32>
    %109 = arith.addf %107, %108 : vector<32x32xf32>
    %c256_44 = arith.constant 256 : index
    %c0_45 = arith.constant 0 : index
    %110 = vector.load %arg1[%c256_44, %c0_45] : memref<512x32xbf16, #tpu.memory_space<vmem>>, vector<128x32xbf16>
    %cst_46 = arith.constant dense<0.000000e+00> : vector<128x32xf32>
    %111 = tpu.matmul %110, %84, %cst_46 {dimension_numbers = #tpu.dot_dimension_numbers<[1], [0], [0], [1], [0, 0, 1, 1], [], []>} : vector<128x32xbf16>, vector<32x32xbf16>, vector<128x32xf32> -> vector<128x32xf32>
    %c768 = arith.constant 768 : index
    %c0_47 = arith.constant 0 : index
    %112 = vector.load %arg2[%c768, %c0_47] : memref<1024x32xf32, #tpu.memory_space<vmem>>, vector<128x32xf32>
    %113 = arith.mulf %111, %112 : vector<128x32xf32>
    %114 = vector.extract_strided_slice %113 {offsets = [0, 0], sizes = [32, 32], strides = [1, 1]} : vector<128x32xf32> to vector<32x32xf32>
    %115 = arith.addf %109, %114 : vector<32x32xf32>
    %116 = vector.extract_strided_slice %113 {offsets = [32, 0], sizes = [32, 32], strides = [1, 1]} : vector<128x32xf32> to vector<32x32xf32>
    %117 = arith.addf %115, %116 : vector<32x32xf32>
    %118 = vector.extract_strided_slice %113 {offsets = [64, 0], sizes = [32, 32], strides = [1, 1]} : vector<128x32xf32> to vector<32x32xf32>
    %119 = arith.addf %117, %118 : vector<32x32xf32>
    %120 = vector.extract_strided_slice %113 {offsets = [96, 0], sizes = [32, 32], strides = [1, 1]} : vector<128x32xf32> to vector<32x32xf32>
    %121 = arith.addf %119, %120 : vector<32x32xf32>
    %c384_48 = arith.constant 384 : index
    %c0_49 = arith.constant 0 : index
    %122 = vector.load %arg1[%c384_48, %c0_49] : memref<512x32xbf16, #tpu.memory_space<vmem>>, vector<128x32xbf16>
    %cst_50 = arith.constant dense<0.000000e+00> : vector<128x32xf32>
    %123 = tpu.matmul %122, %84, %cst_50 {dimension_numbers = #tpu.dot_dimension_numbers<[1], [0], [0], [1], [0, 0, 1, 1], [], []>} : vector<128x32xbf16>, vector<32x32xbf16>, vector<128x32xf32> -> vector<128x32xf32>
    %c896 = arith.constant 896 : index
    %c0_51 = arith.constant 0 : index
    %124 = vector.load %arg2[%c896, %c0_51] : memref<1024x32xf32, #tpu.memory_space<vmem>>, vector<128x32xf32>
    %125 = arith.mulf %123, %124 : vector<128x32xf32>
    %126 = vector.extract_strided_slice %125 {offsets = [0, 0], sizes = [32, 32], strides = [1, 1]} : vector<128x32xf32> to vector<32x32xf32>
    %127 = arith.addf %121, %126 : vector<32x32xf32>
    %128 = vector.extract_strided_slice %125 {offsets = [32, 0], sizes = [32, 32], strides = [1, 1]} : vector<128x32xf32> to vector<32x32xf32>
    %129 = arith.addf %127, %128 : vector<32x32xf32>
    %130 = vector.extract_strided_slice %125 {offsets = [64, 0], sizes = [32, 32], strides = [1, 1]} : vector<128x32xf32> to vector<32x32xf32>
    %131 = arith.addf %129, %130 : vector<32x32xf32>
    %132 = vector.extract_strided_slice %125 {offsets = [96, 0], sizes = [32, 32], strides = [1, 1]} : vector<128x32xf32> to vector<32x32xf32>
    %133 = arith.addf %131, %132 : vector<32x32xf32>
    %cst_52 = arith.constant dense<0.000000e+00> : vector<32xf32>
    %134 = vector.multi_reduction <add>, %133, %cst_52 [1] : vector<32x32xf32> to vector<32xf32>
    %135 = vector.shape_cast %134 : vector<32xf32> to vector<32x1xf32>
    %cst_53 = arith.constant 3.200000e+01 : f32
    %136 = vector.broadcast %cst_53 : f32 to vector<32x1xf32>
    %137 = arith.divf %135, %136 : vector<32x1xf32>
    %138 = vector.broadcast %137 : vector<32x1xf32> to vector<32x32xf32>
    %139 = arith.subf %133, %138 : vector<32x32xf32>
    %140 = arith.mulf %139, %139 : vector<32x32xf32>
    %cst_54 = arith.constant dense<0.000000e+00> : vector<32xf32>
    %141 = vector.multi_reduction <add>, %140, %cst_54 [1] : vector<32x32xf32> to vector<32xf32>
    %142 = vector.shape_cast %141 : vector<32xf32> to vector<32x1xf32>
    %cst_55 = arith.constant 3.200000e+01 : f32
    %143 = vector.broadcast %cst_55 : f32 to vector<32x1xf32>
    %144 = arith.divf %142, %143 : vector<32x1xf32>
    %cst_56 = arith.constant 9.99999974E-6 : f32
    %145 = vector.broadcast %cst_56 : f32 to vector<32x1xf32>
    %146 = arith.addf %144, %145 : vector<32x1xf32>
    %147 = math.rsqrt %146 : vector<32x1xf32>
    %148 = vector.broadcast %147 : vector<32x1xf32> to vector<32x32xf32>
    %149 = arith.mulf %139, %148 : vector<32x32xf32>
    %150 = arith.truncf %149 : vector<32x32xf32> to vector<32x32xbf16>
    %c32 = arith.constant 32 : index
    %c0_57 = arith.constant 0 : index
    %151 = vector.load %arg3[%c32, %c0_57] : memref<64x32xbf16, #tpu.memory_space<vmem>>, vector<32x32xbf16>
    %cst_58 = arith.constant dense<0.000000e+00> : vector<32x32xf32>
    %152 = tpu.matmul %150, %151, %cst_58 {dimension_numbers = #tpu.dot_dimension_numbers<[1], [0], [0], [1], [0, 0, 1, 1], [], []>} : vector<32x32xbf16>, vector<32x32xbf16>, vector<32x32xf32> -> vector<32x32xf32>
    %c1 = arith.constant 1 : index
    %c0_59 = arith.constant 0 : index
    %153 = vector.load %arg4[%c1, %c0_59] : memref<2x32xf32, #tpu.memory_space<vmem>>, vector<1x32xf32>
    %154 = vector.broadcast %153 : vector<1x32xf32> to vector<32x32xf32>
    %155 = arith.addf %152, %154 : vector<32x32xf32>
    %cst_60 = arith.constant 0.000000e+00 : f32
    %156 = vector.broadcast %cst_60 : f32 to vector<32x32xf32>
    %157 = arith.maximumf %155, %156 : vector<32x32xf32>
    %158 = arith.truncf %157 : vector<32x32xf32> to vector<32x32xbf16>
    %c32_61 = arith.constant 32 : index
    %c0_62 = arith.constant 0 : index
    %159 = vector.load %arg5[%c32_61, %c0_62] : memref<64x32xbf16, #tpu.memory_space<vmem>>, vector<32x32xbf16>
    %cst_63 = arith.constant dense<0.000000e+00> : vector<32x32xf32>
    %160 = tpu.matmul %158, %159, %cst_63 {dimension_numbers = #tpu.dot_dimension_numbers<[1], [0], [0], [1], [0, 0, 1, 1], [], []>} : vector<32x32xbf16>, vector<32x32xbf16>, vector<32x32xf32> -> vector<32x32xf32>
    %c1_64 = arith.constant 1 : index
    %c0_65 = arith.constant 0 : index
    %161 = vector.load %arg6[%c1_64, %c0_65] : memref<2x32xf32, #tpu.memory_space<vmem>>, vector<1x32xf32>
    %162 = vector.broadcast %161 : vector<1x32xf32> to vector<32x32xf32>
    %163 = arith.addf %160, %162 : vector<32x32xf32>
    %cst_66 = arith.constant 0.000000e+00 : f32
    %164 = vector.broadcast %cst_66 : f32 to vector<32x32xf32>
    %165 = arith.maximumf %163, %164 : vector<32x32xf32>
    %166 = arith.addf %83, %165 : vector<32x32xf32>
    %167 = arith.truncf %166 : vector<32x32xf32> to vector<32x32xbf16>
    %c0_67 = arith.constant 0 : index
    %c0_68 = arith.constant 0 : index
    %168 = vector.load %arg7[%c0_67, %c0_68] : memref<32x128xbf16, #tpu.memory_space<vmem>>, vector<32x128xbf16>
    %cst_69 = arith.constant dense<0.000000e+00> : vector<32x128xf32>
    %169 = tpu.matmul %167, %168, %cst_69 {dimension_numbers = #tpu.dot_dimension_numbers<[1], [0], [0], [1], [0, 0, 1, 1], [], []>} : vector<32x32xbf16>, vector<32x128xbf16>, vector<32x128xf32> -> vector<32x128xf32>
    %c0_70 = arith.constant 0 : index
    %c0_71 = arith.constant 0 : index
    %170 = vector.load %arg8[%c0_70, %c0_71] : memref<1x128xf32, #tpu.memory_space<vmem>>, vector<1x128xf32>
    %171 = vector.broadcast %170 : vector<1x128xf32> to vector<32x128xf32>
    %172 = arith.addf %169, %171 : vector<32x128xf32>
    %c0_72 = arith.constant 0 : index
    %c0_73 = arith.constant 0 : index
    %173 = vector.load %arg9[%c0_72, %c0_73] : memref<32x128xf32, #tpu.memory_space<vmem>>, vector<32x128xf32>
    tpu.vector_store %arg9[%c0_72, %c0_73], %172 {strides = array<i32>} : memref<32x128xf32, #tpu.memory_space<vmem>>, vector<32x128xf32>,
    return
  }
}

</mosaic_0001>

<bundles_post_ra>
// kernel: tpu_custom_call.1
= control target key start
LH: loop header
LB: loop body
LE: loop exit
PB: predicated region body
PF: predicated region fallthrough
CT: control target
= control target key end

     0   :  { %s3074_s0 = inlined_call_operand.vmem [shape: f32[32,32], index: 0, kind: input, shape index: {}]   ;;  %s3075_s1 = inlined_call_operand.vmem [shape: bf16[512,32], index: 1, kind: input, shape index: {}]   ;;  %s3076_s2 = inlined_call_operand.vmem [shape: f32[1024,32], index: 2, kind: input, shape index: {}]   ;;  %s3077_s3 = inlined_call_operand.vmem [shape: bf16[64,32], index: 3, kind: input, shape index: {}]   ;;  %s3078_s4 = inlined_call_operand.vmem [shape: f32[2,32], index: 4, kind: input, shape index: {}]   ;;  %s3079_s5 = inlined_call_operand.vmem [shape: bf16[64,32], index: 5, kind: input, shape index: {}]   ;;  %s3080_s6 = inlined_call_operand.vmem [shape: f32[2,32], index: 6, kind: input, shape index: {}]   ;;  %s3081_s7 = inlined_call_operand.vmem [shape: bf16[32,128], index: 7, kind: input, shape index: {}]   ;;  %s3082_s8 = inlined_call_operand.vmem [shape: f32[1,128], index: 8, kind: input, shape index: {}]   ;;  %s3083_s9 = inlined_call_operand.hbm [shape: f32[32,128], index: 9, kind: output, shape index: {}]  }
   0x1   :  { %v1991_v0 = vld [vmem:[%s3074_s0 + $0x10] sm:$0xff]  ;;  %v1996_v1 = vld [vmem:[%s3074_s0 + $0x18] sm:$0xff]  ;;  %v2001_v2 = vld [vmem:[%s3074_s0] sm:$0xff] }
   0x2   :  { %v39_v3 = vpack.c.bf16 %v1996_v1, %v1991_v0  ;;  %v2008_v4 = vld [vmem:[%s3074_s0 + $0x8] sm:$0xff] }
   0x3   :  { %v38_v5 = vpack.c.bf16 %v2008_v4, %v2001_v2 }
   0x4   :  { %127 = vmatpush.bf16.msra.mxu0 %v39_v3  ;;  %1879 = vmatpush.bf16.msra.mxu1 %v39_v3 }
   0x5   :  { %481 = vmatpush.bf16.msra.mxu2 %v39_v3  ;;  %658 = vmatpush.bf16.msra.mxu3 %v39_v3 }
   0x6   :  { %14 = vsyncpa [#allocation3], 0  ;;  %v2015_v6 = vld [vmem:[%s3075_s1] sm:$0xff]  ;;  %v2020_v7 = vld [vmem:[%s3075_s1 + $0x38] sm:$0xff]  ;;  %vm96_vm0 = vcmask 261120   ;;  %s1935_s18 = smov [#allocation2]  }
   0x7   :  { %3114 = vst [vmem:[#allocation5_spill] sm:$0xff] %v2020_v7  ;;  %v2025_v8 = vld [vmem:[%s3075_s1 + $0x80] sm:$0xff]  ;;  %v2043_v10 = vld [vmem:[%s3075_s1 + $0x8] sm:$0xff]  ;;  %v2071_v14 = vld [vmem:[%s3075_s1 + $0x10] sm:$0xff]  ;;  %s1581_s19 = sshll.u32 %s1935_s18, 4  ;;  %s1583_s21 = sshll.u32 %s3083_s9, 4  ;;  %s1582_s19 = int_to_ptr.vmem [resolvable:$true] %s1581_s19  ;;  %s1584_s21 = int_to_ptr.hbm [resolvable:$true] %s1583_s21 }
   0x8   :  { %128 = vmatpush.bf16.msra.mxu0 %v38_v5  ;;  %1880 = vmatpush.bf16.msra.mxu1 %v38_v5  ;;  %v2030_v9 = vld [vmem:[%s3075_s1 + $0xc0] sm:$0xff]  ;;  %v2053_v12 = vld [vmem:[%s3075_s1 + $0x88] sm:$0xff]  ;;  %3117 = vst [vmem:[#allocation8_spill] sm:$0xff] %v2071_v14  ;;  %v2081_v16 = vld [vmem:[%s3075_s1 + $0x90] sm:$0xff]  ;;  %s1937_s22 = smov 8  }
   0x9   :  { %482 = vmatpush.bf16.msra.mxu2 %v38_v5  ;;  %659 = vmatpush.bf16.msra.mxu3 %v38_v5  ;;  %v2048_v11 = vld [vmem:[%s3075_s1 + $0x40] sm:$0xff]  ;;  %3115 = vst [vmem:[#allocation6_spill] sm:$0xff] %v2053_v12  ;;  %v2058_v13 = vld [vmem:[%s3075_s1 + $0xc8] sm:$0xff]  ;;  %v2086_v17 = vld [vmem:[%s3075_s1 + $0xd0] sm:$0xff] }
   0xa   :  { %3116 = vst [vmem:[#allocation7_spill] sm:$0xff] %v2058_v13  ;;  %v2076_v15 = vld [vmem:[%s3075_s1 + $0x48] sm:$0xff]  ;;  %v2099_v18 = vld [vmem:[%s3075_s1 + $0x18] sm:$0xff]  ;;  %v2104_v19 = vld [vmem:[%s3075_s1 + $0x50] sm:$0xff] }
   0xb   :  { %1627 = vmatmul.msk.bf16.vlgmr.msra.gmra.mxu0 %vm96_vm0, %v2015_v6  ;;  %1634 = vmatmul.msk.bf16.vlgmr.msra.gmra.mxu1 %vm96_vm0, %v2020_v7  ;;  %3118 = vst [vmem:[#allocation9_spill] sm:$0xff] %v2076_v15  ;;  %v2109_v20 = vld [vmem:[%s3075_s1 + $0x98] sm:$0xff]  ;;  %v2127_v22 = vld [vmem:[%s3075_s1 + $0x20] sm:$0xff]  ;;  %v2155_v26 = vld [vmem:[%s3075_s1 + $0x28] sm:$0xff] }
   0xc   :  { %304 = vmatpush.bf16.msrb.mxu1 %v39_v3  ;;  %1707 = vmatmul.msk.bf16.vlgmr.msra.gmra.mxu2 %vm96_vm0, %v2025_v8  ;;  %3119 = vst [vmem:[#allocation10_spill] sm:$0xff] %v2081_v16  ;;  %v2114_v21 = vld [vmem:[%s3075_s1 + $0xd8] sm:$0xff]  ;;  %v2137_v24 = vld [vmem:[%s3075_s1 + $0xa0] sm:$0xff]  ;;  %v2165_v28 = vld [vmem:[%s3075_s1 + $0xa8] sm:$0xff] }
   0xd   :  { %1747 = vmatmul.msk.bf16.vlgmr.msra.gmra.mxu3 %vm96_vm0, %v2030_v9  ;;  %3120 = vst [vmem:[#allocation11_spill] sm:$0xff] %v2086_v17  ;;  %v2132_v23 = vld [vmem:[%s3075_s1 + $0x58] sm:$0xff]  ;;  %v2142_v25 = vld [vmem:[%s3075_s1 + $0xe0] sm:$0xff]  ;;  %v2170_v29 = vld [vmem:[%s3075_s1 + $0xe8] sm:$0xff] }
   0xe   :  { %3121 = vst [vmem:[#allocation12_spill] sm:$0xff] %v2099_v18  ;;  %v2160_v27 = vld [vmem:[%s3075_s1 + $0x60] sm:$0xff]  ;;  %v2183_v30 = vld [vmem:[%s3075_s1 + $0x30] sm:$0xff]  ;;  %v2188_v31 = vld [vmem:[%s3075_s1 + $0x68] sm:$0xff] }
   0xf   :  { %3122 = vst [vmem:[#allocation13_spill] sm:$0xff] %v2104_v19  ;;  %v2193_v32 = vld [vmem:[%s3075_s1 + $0xb0] sm:$0xff]  ;;  %v2216_v35 = vld [vmem:[%s3075_s1 + $0xb8] sm:$0xff] }
  0x10   :  { %305 = vmatpush.bf16.msrb.mxu1 %v38_v5  ;;  %3123 = vst [vmem:[#allocation14_spill] sm:$0xff] %v2109_v20  ;;  %v2198_v33 = vld [vmem:[%s3075_s1 + $0xf0] sm:$0xff]  ;;  %v2221_v36 = vld [vmem:[%s3075_s1 + $0xf8] sm:$0xff] }
  0x11   :  { %3124 = vst [vmem:[#allocation15_spill] sm:$0xff] %v2114_v21  ;;  %v2211_v34 = vld [vmem:[%s3075_s1 + $0x70] sm:$0xff]  ;;  %v2232_v37 = vld [vmem:[%s3075_s1 + $0x78] sm:$0xff] }
  0x12   :  { %3125 = vst [vmem:[#allocation16_spill] sm:$0xff] %v2127_v22 }
  0x13   :  { %3126 = vst [vmem:[#allocation17_spill] sm:$0xff] %v2132_v23 }
  0x14   :  { %3127 = vst [vmem:[#allocation18_spill] sm:$0xff] %v2137_v24 }
  0x15   :  { %3128 = vst [vmem:[#allocation19_spill] sm:$0xff] %v2142_v25 }
  0x16   :  { %3129 = vst [vmem:[#allocation20_spill] sm:$0xff] %v2155_v26 }
  0x17   :  { %3130 = vst [vmem:[#allocation21_spill] sm:$0xff] %v2160_v27 }
  0x18   :  { %3131 = vst [vmem:[#allocation22_spill] sm:$0xff] %v2165_v28 }
  0x19   :  { %3132 = vst [vmem:[#allocation23_spill] sm:$0xff] %v2170_v29 }
  0x1a   :  { %3133 = vst [vmem:[#allocation24_spill] sm:$0xff] %v2183_v30 }
  0x1b   :  { %1628 = vmatmul.msk.bf16.gmra.mxu0 %vm96_vm0, %v2043_v10  ;;  %1667 = vmatmul.msk.bf16.vlgmr.msrb.gmra.mxu1 %vm96_vm0, %v2048_v11  ;;  %3134 = vst [vmem:[#allocation25_spill] sm:$0xff] %v2188_v31 }
  0x1c   :  { %1708 = vmatmul.msk.bf16.gmra.mxu2 %vm96_vm0, %v2053_v12  ;;  %3135 = vst [vmem:[#allocation26_spill] sm:$0xff] %v2193_v32 }
  0x1d   :  { %1748 = vmatmul.msk.bf16.gmra.mxu3 %vm96_vm0, %v2058_v13  ;;  %3136 = vst [vmem:[#allocation27_spill] sm:$0xff] %v2198_v33 }
  0x1e   :  { %3137 = vst [vmem:[#allocation28_spill] sm:$0xff] %v2211_v34 }
  0x1f   :  { %3138 = vst [vmem:[#allocation29_spill] sm:$0xff] %v2216_v35 }
  0x20   :  { %3139 = vst [vmem:[#allocation30_spill] sm:$0xff] %v2221_v36 }
  0x21   :  { %3140 = vst [vmem:[#allocation31_spill] sm:$0xff] %v2232_v37 }
  0x2b   :  { %1629 = vmatmul.msk.bf16.gmra.mxu0 %vm96_vm0, %v2071_v14  ;;  %1668 = vmatmul.msk.bf16.gmra.mxu1 %vm96_vm0, %v2076_v15  ;;  %v174_v14 = vld [vmem:[%s3076_s2 + $0x20] sm:$0xff] }
  0x2c   :  { %1709 = vmatmul.msk.bf16.gmra.mxu2 %vm96_vm0, %v2081_v16 }
  0x2d   :  { %1749 = vmatmul.msk.bf16.gmra.mxu3 %vm96_vm0, %v2086_v17  ;;  %v349_v17 = vld [vmem:[%s3076_s2 + $0x90] sm:$0xff] }
  0x3b   :  { %1630 = vmatmul.msk.bf16.gmra.mxu0 %vm96_vm0, %v2099_v18  ;;  %1669 = vmatmul.msk.bf16.gmra.mxu1 %vm96_vm0, %v2104_v19 }
  0x3c   :  { %1710 = vmatmul.msk.bf16.gmra.mxu2 %vm96_vm0, %v2109_v20 }
  0x3d   :  { %1750 = vmatmul.msk.bf16.gmra.mxu3 %vm96_vm0, %v2114_v21 }
  0x4b   :  { %1631 = vmatmul.msk.bf16.gmra.mxu0 %vm96_vm0, %v2127_v22  ;;  %1670 = vmatmul.msk.bf16.gmra.mxu1 %vm96_vm0, %v2132_v23  ;;  %v184_v22 = vld [vmem:[%s3076_s2 + $0x70] sm:$0xff] }
  0x4c   :  { %1711 = vmatmul.msk.bf16.gmra.mxu2 %vm96_vm0, %v2137_v24 }
  0x4d   :  { %1751 = vmatmul.msk.bf16.gmra.mxu3 %vm96_vm0, %v2142_v25  ;;  %v180_v25 = vld [vmem:[%s3076_s2 + $0x50] sm:$0xff] }
  0x5b   :  { %1632 = vmatmul.msk.bf16.gmra.mxu0 %vm96_vm0, %v2155_v26  ;;  %1671 = vmatmul.msk.bf16.gmra.mxu1 %vm96_vm0, %v2160_v27 }
  0x5c   :  { %1712 = vmatmul.msk.bf16.gmra.mxu2 %vm96_vm0, %v2165_v28  ;;  %v176_v28 = vld [vmem:[%s3076_s2 + $0x30] sm:$0xff] }
  0x5d   :  { %1752 = vmatmul.msk.bf16.gmra.mxu3 %vm96_vm0, %v2170_v29 }
  0x6b   :  { %1633 = vmatmul.msk.bf16.gmra.mxu0 %vm96_vm0, %v2183_v30  ;;  %1672 = vmatmul.msk.bf16.gmra.mxu1 %vm96_vm0, %v2188_v31  ;;  %v172_v31 = vld [vmem:[%s3076_s2 + $0x10] sm:$0xff] }
  0x6c   :  { %1713 = vmatmul.msk.bf16.gmra.mxu2 %vm96_vm0, %v2193_v32 }
  0x6d   :  { %1753 = vmatmul.msk.bf16.gmra.mxu3 %vm96_vm0, %v2198_v33 }
  0x7b   :  { %1673 = vmatmul.msk.bf16.gmra.mxu1 %vm96_vm0, %v2211_v34 }
  0x7c   :  { %1714 = vmatmul.msk.bf16.gmra.mxu2 %vm96_vm0, %v2216_v35 }
  0x7d   :  { %1754 = vmatmul.msk.bf16.gmra.mxu3 %vm96_vm0, %v2221_v36 }
  0x88   :  { %v2234_v38 = vpop.f32.mrf.mxu0  ;;  %v165_v39 = vpop.f32.mrf.mxu1 }
  0x8b   :  { %1674 = vmatmul.msk.bf16.gmra.mxu1 %vm96_vm0, %v2232_v37 }
  0x8f   :  { %v2238_v40 = vpop.f32.mrf.mxu2 }
  0x90   :  { %v2240_v41 = vpop.f32.mrf.mxu0  ;;  %v2242_v42 = vpop.f32.mrf.mxu1 }
  0x91   :  { %v2244_v43 = vpop.f32.mrf.mxu3 }
  0x97   :  { %v2246_v44 = vpop.f32.mrf.mxu2 }
  0x98   :  { %v135_v45 = vpop.f32.mrf.mxu0  ;;  %v2248_v46 = vpop.f32.mrf.mxu1 }
  0x99   :  { %v2250_v47 = vpop.f32.mrf.mxu3  ;;  %v188_v24 = vmul.f32 %v172_v31, %v135_v45 }
  0x9f   :  { %v2252_v48 = vpop.f32.mrf.mxu2 }
  0xa0   :  { %v2254_v49 = vpop.f32.mrf.mxu0  ;;  %v2256_v50 = vpop.f32.mrf.mxu1 }
  0xa1   :  { %v2258_v51 = vpop.f32.mrf.mxu3 }
  0xa7   :  { %v2260_v52 = vpop.f32.mrf.mxu2 }
  0xa8   :  { %v140_v53 = vpop.f32.mrf.mxu0  ;;  %v312_v54 = vpop.f32.mrf.mxu1 }
  0xa9   :  { %v2262_v55 = vpop.f32.mrf.mxu3  ;;  %v365_v19 = vmul.f32 %v349_v17, %v312_v54 }
  0xaf   :  { %v2264_v56 = vpop.f32.mrf.mxu2 }
  0xb0   :  { %v142_v57 = vpop.f32.mrf.mxu0  ;;  %v2266_v58 = vpop.f32.mrf.mxu1 }
  0xb1   :  { %v2268_v59 = vpop.f32.mrf.mxu3 }
  0xb7   :  { %v2270_v60 = vpop.f32.mrf.mxu2 }
  0xb8   :  { %v145_v61 = vpop.f32.mrf.mxu0  ;;  %v2272_v62 = vpop.f32.mrf.mxu1 }
  0xb9   :  { %v2274_v63 = vpop.f32.mrf.mxu3  ;;  %v192_v26 = vmul.f32 %v176_v28, %v145_v61  ;;  %v200_v61 = vmul.f32 %v184_v22, %v165_v39  ;;  %v347_v39 = vld [vmem:[%s3076_s2 + $0x80] sm:$0xff] }
  0xbb   :  { %v208_v23 = vadd.f32 %v192_v26, %v188_v24 }
  0xbf   :  { %v2276_v3 = vpop.f32.mrf.mxu2 }
  0xc0   :  { %v2278_v5 = vpop.f32.mrf.mxu0  ;;  %v2280_v36 = vpop.f32.mrf.mxu1 }
  0xc1   :  { %v2282_v35 = vpop.f32.mrf.mxu3 }
  0xc7   :  { %v2284_v37 = vpop.f32.mrf.mxu2 }
  0xc8   :  { %v150_v7 = vpop.f32.mrf.mxu0  ;;  %v2286_v33 = vpop.f32.mrf.mxu1 }
  0xc9   :  { %v2288_v32 = vpop.f32.mrf.mxu3 }
  0xcf   :  { %v2290_v34 = vpop.f32.mrf.mxu2 }
  0xd0   :  { %v152_v30 = vpop.f32.mrf.mxu0  ;;  %v2292_v29 = vpop.f32.mrf.mxu1 }
  0xd1   :  { %v2303_v27 = vpop.f32.mrf.mxu3 }
  0xd7   :  { %v2311_v28 = vpop.f32.mrf.mxu2 }
  0xd8   :  { %v155_v21 = vpop.f32.mrf.mxu0  ;;  %v327_v20 = vpop.f32.mrf.mxu1 }
  0xd9   :  { %v196_v18 = vmul.f32 %v180_v25, %v155_v21  ;;  %v170_v21 = vld [vmem:[%s3076_s2] sm:$0xff]  ;;  %v2328_v17 = vpop.f32.mrf.mxu3 }
  0xda   :  { %v186_v22 = vmul.f32 %v170_v21, %v2234_v38  ;;  %v182_v25 = vld [vmem:[%s3076_s2 + $0x60] sm:$0xff]  ;;  %v179_v21 = vld [vmem:[%s3076_s2 + $0x48] sm:$0xff] }
  0xdb   :  { %v212_v16 = vadd.f32 %v208_v23, %v196_v18  ;;  %v178_v18 = vld [vmem:[%s3076_s2 + $0x40] sm:$0xff] }
  0xdc   :  { %v194_v23 = vmul.f32 %v178_v18, %v150_v7  ;;  %v363_v7 = vmul.f32 %v347_v39, %v2248_v46  ;;  %v195_v46 = vmul.f32 %v179_v21, %v152_v30  ;;  %v355_v30 = vld [vmem:[%s3076_s2 + $0xc0] sm:$0xff] }
  0xdd   :  { %v216_v31 = vadd.f32 %v212_v16, %v200_v61  ;;  %v190_v16 = vmul.f32 %v174_v14, %v140_v53  ;;  %v175_v14 = vld [vmem:[%s3076_s2 + $0x28] sm:$0xff] }
  0xde   :  { %v171_v53 = vld [vmem:[%s3076_s2 + $0x8] sm:$0xff] }
  0xdf   :  { %v2313_v45 = vadd.f32 %v365_v19, %v216_v31  ;;  %v2330_v19 = vpop.f32.mrf.mxu2  ;;  %v206_v26 = vadd.f32 %v190_v16, %v186_v22  ;;  %v191_v16 = vmul.f32 %v175_v14, %v142_v57 }
  0xe0   :  { %v2318_v13 = vpop.f32.mrf.mxu0  ;;  %v2320_v24 = vpop.f32.mrf.mxu1 }
  0xe1   :  { %v210_v31 = vadd.f32 %v206_v26, %v194_v23  ;;  %v2351_v18 = vpop.f32.mrf.mxu3  ;;  %v183_v23 = vld [vmem:[%s3076_s2 + $0x68] sm:$0xff]  ;;  %v351_v26 = vld [vmem:[%s3076_s2 + $0xa0] sm:$0xff] }
  0xe2   :  { %v367_v57 = vmul.f32 %v351_v26, %v2272_v62  ;;  %v371_v62 = vmul.f32 %v355_v30, %v327_v20  ;;  %v528_v20 = vld [vmem:[%s3076_s2 + $0x120] sm:$0xff] }
  0xe8   :  { %v160_v54 = vpop.f32.mrf.mxu0  ;;  %v2339_v61 = vpop.f32.mrf.mxu1 }
  0xe9   :  { %v198_v12 = vmul.f32 %v182_v25, %v160_v54  ;;  %v2356_v25 = vpop.f32.mrf.mxu2  ;;  %v2374_v21 = vpop.f32.mrf.mxu3 }
  0xeb   :  { %v214_v38 = vadd.f32 %v210_v31, %v198_v12  ;;  %v187_v12 = vmul.f32 %v171_v53, %v2240_v41  ;;  %v359_v53 = vld [vmem:[%s3076_s2 + $0xe0] sm:$0xff] }
  0xed   :  { %v379_v22 = vadd.f32 %v363_v7, %v214_v38  ;;  %v207_v31 = vadd.f32 %v191_v16, %v187_v12  ;;  %v348_v7 = vld [vmem:[%s3076_s2 + $0x88] sm:$0xff] }
  0xee   :  { %v364_v16 = vmul.f32 %v348_v7, %v2256_v50  ;;  %v352_v12 = vld [vmem:[%s3076_s2 + $0xa8] sm:$0xff]  ;;  %v181_v7 = vld [vmem:[%s3076_s2 + $0x58] sm:$0xff] }
  0xef   :  { %v211_v14 = vadd.f32 %v207_v31, %v195_v46  ;;  %v383_v38 = vadd.f32 %v379_v22, %v367_v57  ;;  %v177_v22 = vld [vmem:[%s3076_s2 + $0x38] sm:$0xff] }
  0xf0   :  { %v162_v39 = vpop.f32.mrf.mxu0  ;;  %v2362_v54 = vpop.f32.mrf.mxu1  ;;  %v173_v57 = vld [vmem:[%s3076_s2 + $0x18] sm:$0xff] }
  0xf1   :  { %v199_v15 = vmul.f32 %v183_v23, %v162_v39  ;;  %v524_v23 = vld [vmem:[%s3076_s2 + $0x100] sm:$0xff]  ;;  %v387_v31 = vadd.f32 %v383_v38, %v371_v62 }
  0xf2   :  { %v540_v50 = vmul.f32 %v524_v23, %v2238_v40  ;;  %v532_v38 = vld [vmem:[%s3076_s2 + $0x140] sm:$0xff]  ;;  %v356_v40 = vld [vmem:[%s3076_s2 + $0xc8] sm:$0xff]  ;;  %v189_v23 = vmul.f32 %v173_v57, %v2254_v49 }
  0xf3   :  { %v215_v41 = vadd.f32 %v211_v14, %v199_v15  ;;  %v514_v15 = vpop.f32.mrf.mxu2  ;;  %v368_v14 = vmul.f32 %v352_v12, %v2280_v36  ;;  %v544_v36 = vmul.f32 %v528_v20, %v2264_v56  ;;  %v360_v12 = vld [vmem:[%s3076_s2 + $0xe8] sm:$0xff]  ;;  %v701_v49 = vld [vmem:[%s3076_s2 + $0x180] sm:$0xff]  ;;  %v691_v20 = vpop.f32.mrf.mxu3 }
  0xf4   :  { %v525_v56 = vld [vmem:[%s3076_s2 + $0x108] sm:$0xff] }
  0xf5   :  { %v380_v26 = vadd.f32 %v364_v16, %v215_v41  ;;  %v193_v41 = vmul.f32 %v177_v22, %v2278_v5  ;;  %v197_v5 = vmul.f32 %v181_v7, %v2318_v13  ;;  %v372_v22 = vmul.f32 %v356_v40, %v2320_v24  ;;  %v357_v24 = vld [vmem:[%s3076_s2 + $0xd0] sm:$0xff]  ;;  %v529_v7 = vld [vmem:[%s3076_s2 + $0x128] sm:$0xff] }
  0xf6   :  { %v541_v40 = vmul.f32 %v525_v56, %v2246_v44  ;;  %v350_v44 = vld [vmem:[%s3076_s2 + $0x98] sm:$0xff] }
  0xf7   :  { %v384_v62 = vadd.f32 %v380_v26, %v368_v14  ;;  %v209_v26 = vadd.f32 %v193_v41, %v189_v23 }
  0xf8   :  { %v337_v46 = vpop.f32.mrf.mxu1 }
  0xf9   :  { %v375_v39 = vmul.f32 %v359_v53, %v337_v46  ;;  %v536_v53 = vld [vmem:[%s3076_s2 + $0x160] sm:$0xff]  ;;  %v548_v46 = vmul.f32 %v532_v38, %v2290_v34  ;;  %v353_v34 = vld [vmem:[%s3076_s2 + $0xb0] sm:$0xff]  ;;  %v388_v14 = vadd.f32 %v384_v62, %v372_v22  ;;  %v213_v41 = vadd.f32 %v209_v26, %v197_v5 }
  0xfa   :  { %v373_v5 = vmul.f32 %v357_v24, %v2339_v61  ;;  %v545_v22 = vmul.f32 %v529_v7, %v2270_v60  ;;  %v537_v61 = vld [vmem:[%s3076_s2 + $0x168] sm:$0xff]  ;;  %v361_v26 = vld [vmem:[%s3076_s2 + $0xf0] sm:$0xff] }
  0xfb   :  { %v391_v30 = vadd.f32 %v387_v31, %v375_v39  ;;  %v552_v39 = vmul.f32 %v536_v53, %v514_v15  ;;  %v516_v38 = vpop.f32.mrf.mxu2  ;;  %v717_v53 = vmul.f32 %v701_v49, %v2244_v43  ;;  %v713_v43 = vld [vmem:[%s3076_s2 + $0x1e0] sm:$0xff]  ;;  %v702_v60 = vld [vmem:[%s3076_s2 + $0x188] sm:$0xff] }
  0xfd   :  { %v556_v16 = vadd.f32 %v540_v50, %v391_v30  ;;  %v185_v50 = vld [vmem:[%s3076_s2 + $0x78] sm:$0xff]  ;;  %v705_v30 = vld [vmem:[%s3076_s2 + $0x1a0] sm:$0xff] }
  0xfe   :  { %v201_v23 = vmul.f32 %v185_v50, %v2242_v42  ;;  %v721_v42 = vmul.f32 %v705_v30, %v2268_v59  ;;  %v729_v50 = vmul.f32 %v713_v43, %v691_v20  ;;  %v553_v20 = vmul.f32 %v537_v61, %v516_v38 }
  0xff   :  { %v560_v31 = vadd.f32 %v556_v16, %v544_v36  ;;  %v709_v36 = vld [vmem:[%s3076_s2 + $0x1c0] sm:$0xff] }
 0x100   :  { %v339_v13 = vpop.f32.mrf.mxu1  ;;  %v725_v56 = vmul.f32 %v709_v36, %v2303_v27  ;;  %v526_v27 = vld [vmem:[%s3076_s2 + $0x110] sm:$0xff]  ;;  %v693_v36 = vpop.f32.mrf.mxu3 }
 0x101   :  { %v564_v15 = vadd.f32 %v560_v31, %v548_v46  ;;  %v376_v57 = vmul.f32 %v360_v12, %v339_v13  ;;  %v369_v12 = vmul.f32 %v353_v34, %v2286_v33  ;;  %v533_v46 = vld [vmem:[%s3076_s2 + $0x148] sm:$0xff]  ;;  %v217_v31 = vadd.f32 %v213_v41, %v201_v23 }
 0x102   :  { %v549_v59 = vmul.f32 %v533_v46, %v2311_v28  ;;  %v358_v28 = vld [vmem:[%s3076_s2 + $0xd8] sm:$0xff] }
 0x103   :  { %v568_v16 = vadd.f32 %v564_v15, %v552_v39  ;;  %v392_v62 = vadd.f32 %v388_v14, %v376_v57  ;;  %v385_v49 = vadd.f32 %v2313_v45, %v369_v12  ;;  %v366_v45 = vmul.f32 %v350_v44, %v2266_v58  ;;  %v706_v57 = vld [vmem:[%s3076_s2 + $0x1a8] sm:$0xff]  ;;  %v354_v14 = vld [vmem:[%s3076_s2 + $0xb8] sm:$0xff]  ;;  %v519_v44 = vpop.f32.mrf.mxu2 }
 0x104   :  { %v718_v58 = vmul.f32 %v702_v60, %v2250_v47  ;;  %v722_v46 = vmul.f32 %v706_v57, %v2274_v63  ;;  %v370_v47 = vmul.f32 %v354_v14, %v2292_v29  ;;  %v374_v43 = vmul.f32 %v358_v28, %v2362_v54  ;;  %v362_v54 = vld [vmem:[%s3076_s2 + $0xf8] sm:$0xff]  ;;  %v711_v57 = vld [vmem:[%s3076_s2 + $0x1d0] sm:$0xff] }
 0x105   :  { %v733_v39 = vadd.f32 %v717_v53, %v568_v16  ;;  %v557_v33 = vadd.f32 %v541_v40, %v392_v62  ;;  %v389_v24 = vadd.f32 %v385_v49, %v373_v5  ;;  %v530_v40 = vld [vmem:[%s3076_s2 + $0x130] sm:$0xff]  ;;  %v382_v53 = vadd.f32 %v366_v45, %v217_v31  ;;  %v710_v62 = vld [vmem:[%s3076_s2 + $0x1c8] sm:$0xff] }
 0x106   :  { %v542_v16 = vmul.f32 %v526_v27, %v2252_v48  ;;  %v534_v5 = vld [vmem:[%s3076_s2 + $0x150] sm:$0xff]  ;;  %v726_v29 = vmul.f32 %v710_v62, %v2328_v17  ;;  %v714_v31 = vld [vmem:[%s3076_s2 + $0x1e8] sm:$0xff]  ;;  %v527_v17 = vld [vmem:[%s3076_s2 + $0x118] sm:$0xff] }
 0x107   :  { %v561_v13 = vadd.f32 %v557_v33, %v545_v22  ;;  %v737_v34 = vadd.f32 %v733_v39, %v721_v42  ;;  %v538_v48 = vld [vmem:[%s3076_s2 + $0x170] sm:$0xff]  ;;  %v546_v22 = vmul.f32 %v530_v40, %v2276_v3  ;;  %v386_v33 = vadd.f32 %v382_v53, %v370_v47 }
 0x108   :  { %v342_v15 = vpop.f32.mrf.mxu1  ;;  %v703_v3 = vld [vmem:[%s3076_s2 + $0x190] sm:$0xff]  ;;  %v554_v49 = vmul.f32 %v538_v48, %v519_v44 }
 0x109   :  { %v565_v7 = vadd.f32 %v561_v13, %v549_v59  ;;  %v377_v30 = vmul.f32 %v361_v26, %v342_v15  ;;  %v741_v41 = vadd.f32 %v737_v34, %v725_v56  ;;  %v550_v56 = vmul.f32 %v534_v5, %v2330_v19  ;;  %v707_v13 = vld [vmem:[%s3076_s2 + $0x1b0] sm:$0xff]  ;;  %v531_v19 = vld [vmem:[%s3076_s2 + $0x138] sm:$0xff] }
 0x10a   :  { %v390_v60 = vadd.f32 %v386_v33, %v374_v43  ;;  %v730_v34 = vmul.f32 %v714_v31, %v693_v36  ;;  %v543_v15 = vmul.f32 %v527_v17, %v2260_v52  ;;  %v547_v52 = vmul.f32 %v531_v19, %v2284_v37  ;;  %v704_v37 = vld [vmem:[%s3076_s2 + $0x198] sm:$0xff] }
 0x10b   :  { %v569_v23 = vadd.f32 %v565_v7, %v553_v20  ;;  %v393_v12 = vadd.f32 %v389_v24, %v377_v30  ;;  %v2488_v38 = vadd.f32 %v741_v41, %v729_v50  ;;  %v719_v24 = vmul.f32 %v703_v3, %v2258_v51  ;;  %v535_v30 = vld [vmem:[%s3076_s2 + $0x158] sm:$0xff]  ;;  %v696_v51 = vpop.f32.mrf.mxu3  ;;  %v715_v41 = vld [vmem:[%s3076_s2 + $0x1f0] sm:$0xff] }
 0x10c   :  { %v723_v7 = vmul.f32 %v707_v13, %v2282_v35  ;;  %v727_v36 = vmul.f32 %v711_v57, %v2351_v18  ;;  %v539_v35 = vld [vmem:[%s3076_s2 + $0x178] sm:$0xff]  ;;  %v551_v62 = vmul.f32 %v535_v30, %v2356_v25  ;;  %v720_v44 = vmul.f32 %v704_v37, %v2262_v55 }
 0x10d   :  { %v734_v42 = vadd.f32 %v718_v58, %v569_v23  ;;  %v558_v39 = vadd.f32 %v542_v16, %v393_v12  ;;  %v749_v63 = vsel %vm96_vm0, %v2488_v38, 0.0  ;;  %v521_v16 = vpop.f32.mrf.mxu2  ;;  %v731_v12 = vmul.f32 %v715_v41, %v696_v51  ;;  %v708_v18 = vld [vmem:[%s3076_s2 + $0x1b8] sm:$0xff] }
 0x10e   :  { %750 = vadd.xlane.f32.xlu0 %v749_v63  ;;  %v555_v47 = vmul.f32 %v539_v35, %v521_v16  ;;  %v712_v25 = vld [vmem:[%s3076_s2 + $0x1d8] sm:$0xff] }
 0x10f   :  { %v562_v61 = vadd.f32 %v558_v39, %v546_v22  ;;  %v738_v26 = vadd.f32 %v734_v42, %v722_v46  ;;  %v724_v42 = vmul.f32 %v708_v18, %v2288_v32  ;;  %v716_v33 = vld [vmem:[%s3076_s2 + $0x1f8] sm:$0xff]  ;;  %v728_v31 = vmul.f32 %v712_v25, %v2374_v21 }
 0x110   :  { %v344_v59 = vpop.f32.mrf.mxu1 }
 0x111   :  { %v566_v50 = vadd.f32 %v562_v61, %v550_v56  ;;  %v378_v27 = vmul.f32 %v362_v54, %v344_v59  ;;  %v742_v45 = vadd.f32 %v738_v26, %v726_v29  ;;  %v1934_v61 = vmov 32.0  }
 0x112   :  { %1890 = vrcp.f32 %v1934_v61 }
 0x113   :  { %v570_v14 = vadd.f32 %v566_v50, %v554_v49  ;;  %v394_v28 = vadd.f32 %v390_v60, %v378_v27  ;;  %v746_v20 = vadd.f32 %v742_v45, %v730_v34  ;;  %v698_v29 = vpop.f32.mrf.mxu3 }
 0x114   :  { %v732_v54 = vmul.f32 %v716_v33, %v698_v29 }
 0x115   :  { %v735_v58 = vadd.f32 %v719_v24, %v570_v14  ;;  %v559_v40 = vadd.f32 %v543_v15, %v394_v28  ;;  %v752_v53 = vsel %vm96_vm0, %v746_v20, 0.0 }
 0x116   :  { %753 = vadd.xlane.f32.xlu0 %v752_v53  ;;  %v1870_v53 = vld [vmem:[%s3077_s3 + $0x8] sm:$0xff] }
 0x117   :  { %v563_v23 = vadd.f32 %v559_v40, %v547_v52  ;;  %v739_v46 = vadd.f32 %v735_v58, %v723_v7  ;;  %876 = vmatpush.bf16.msrb.mxu0 %v1870_v53 }
 0x118   :  { %v1891_v32 = vpop.eup %1890 }
 0x119   :  { %v567_v5 = vadd.f32 %v563_v23, %v551_v62  ;;  %v743_v43 = vadd.f32 %v739_v46, %v727_v36  ;;  %v762_v26 = vmul.f32 32.0, %v1891_v32  ;;  %vm766_vm1 = vweird.f32 %v1891_v32  ;;  %v1869_v36 = vld [vmem:[%s3077_s3] sm:$0xff] }
 0x11b   :  { %v571_v48 = vadd.f32 %v567_v5, %v555_v47  ;;  %v747_v22 = vadd.f32 %v743_v43, %v731_v12  ;;  %v763_v17 = vsub.f32 1.0, %v762_v26  ;;  %877 = vmatpush.bf16.msrb.mxu0 %v1869_v36 }
 0x11d   :  { %v736_v39 = vadd.f32 %v720_v44, %v571_v48  ;;  %v755_v63 = vsel %vm96_vm0, %v747_v22, 0.0  ;;  %v764_v60 = vmul.f32 %v1891_v32, %v763_v17 }
 0x11e   :  { %756 = vadd.xlane.f32.xlu1 %v755_v63 }
 0x11f   :  { %v740_v55 = vadd.f32 %v736_v39, %v724_v42  ;;  %v765_v59 = vadd.f32 %v1891_v32, %v764_v60 }
 0x121   :  { %v744_v3 = vadd.f32 %v740_v55, %v728_v31  ;;  %v2558_v13 = vsel %vm766_vm1, %v1891_v32, %v765_v59 }
 0x123   :  { %v748_v56 = vadd.f32 %v744_v3, %v732_v54 }
 0x125   :  { %v758_v49 = vsel %vm96_vm0, %v748_v56, 0.0 }
 0x126   :  { %759 = vadd.xlane.f32.xlu1 %v758_v49 }
 0x181   :  { %v751_v50 = vpop.xlane.xlu0 %750 }
 0x182   :  { %v768_v21 = vmul.f32 %v2558_v13, %v751_v50 }
 0x184   :  { %v2562_v34 = vsub.f32 %v2488_v38, %v768_v21 }
 0x186   :  { %v776_v27 = vmul.f32 %v2562_v34, %v2562_v34 }
 0x188   :  { %v780_v45 = vsel %vm96_vm0, %v776_v27, 0.0 }
 0x189   :  { %781 = vadd.xlane.f32.xlu2 %v780_v45  ;;  %v754_v24 = vpop.xlane.xlu0 %753 }
 0x18a   :  { %v769_v19 = vmul.f32 %v2558_v13, %v754_v24 }
 0x18c   :  { %v773_v15 = vsub.f32 %v746_v20, %v769_v19 }
 0x18e   :  { %v777_v57 = vmul.f32 %v773_v15, %v773_v15 }
 0x190   :  { %v783_v14 = vsel %vm96_vm0, %v777_v57, 0.0 }
 0x191   :  { %v757_v28 = vpop.xlane.xlu1 %756  ;;  %784 = vadd.xlane.f32.xlu2 %v783_v14 }
 0x192   :  { %v770_v7 = vmul.f32 %v2558_v13, %v757_v28 }
 0x194   :  { %v2570_v30 = vsub.f32 %v747_v22, %v770_v7 }
 0x196   :  { %v778_v38 = vmul.f32 %v2570_v30, %v2570_v30 }
 0x198   :  { %v786_v51 = vsel %vm96_vm0, %v778_v38, 0.0 }
 0x199   :  { %v760_v41 = vpop.xlane.xlu1 %759  ;;  %787 = vadd.xlane.f32.xlu0 %v786_v51 }
 0x19a   :  { %v771_v52 = vmul.f32 %v2558_v13, %v760_v41  ;;  %v1872_v41 = vld [vmem:[%s3079_s5 + $0x8] sm:$0xff] }
 0x19b   :  { %925 = vmatpush.bf16.msra.mxu1 %v1872_v41 }
 0x19c   :  { %v2576_v58 = vsub.f32 %v748_v56, %v771_v52  ;;  %v1871_v52 = vld [vmem:[%s3079_s5] sm:$0xff] }
 0x19e   :  { %v779_v20 = vmul.f32 %v2576_v58, %v2576_v58 }
 0x19f   :  { %926 = vmatpush.bf16.msra.mxu1 %v1871_v52 }
 0x1a0   :  { %v789_v40 = vsel %vm96_vm0, %v779_v20, 0.0 }
 0x1a1   :  { %790 = vadd.xlane.f32.xlu1 %v789_v40 }
 0x1fc   :  { %v782_v16 = vpop.xlane.xlu2 %781 }
 0x1fd   :  { %v792_v35 = vmul.f32 %v782_v16, %v2558_v13 }
 0x1ff   :  { %v796_v62 = vadd.f32 1e-05, %v792_v35 }
 0x201   :  { %1892 = vrsqrt.f32 %v796_v62  ;;  %vm806_vm3 = vweird.f32 %v796_v62 }
 0x204   :  { %v785_v23 = vpop.xlane.xlu2 %784 }
 0x205   :  { %v793_v12 = vmul.f32 %v785_v23, %v2558_v13 }
 0x207   :  { %v1893_v46 = vpop.eup %1892  ;;  %v797_v37 = vadd.f32 1e-05, %v793_v12 }
 0x208   :  { %v801_v47 = vmul.f32 %v1893_v46, %v796_v62  ;;  %vm807_vm2 = vweird.f32 %v1893_v46 }
 0x209   :  { %1894 = vrsqrt.f32 %v797_v37  ;;  %vm808_vm5 = vmor %vm806_vm3, %vm807_vm2  ;;  %vm816_vm6 = vweird.f32 %v797_v37 }
 0x20a   :  { %v802_v5 = vmul.f32 %v1893_v46, %v801_v47 }
 0x20c   :  { %v803_v43 = vmul.f32 0.5, %v802_v5  ;;  %v788_v18 = vpop.xlane.xlu0 %787 }
 0x20d   :  { %v794_v44 = vmul.f32 %v788_v18, %v2558_v13 }
 0x20e   :  { %v804_v25 = vsub.f32 1.5, %v803_v43 }
 0x20f   :  { %v1895_v48 = vpop.eup %1894  ;;  %v798_v22 = vadd.f32 1e-05, %v794_v44 }
 0x210   :  { %v811_v42 = vmul.f32 %v1895_v48, %v797_v37  ;;  %v805_v63 = vmul.f32 %v1893_v46, %v804_v25  ;;  %vm817_vm4 = vweird.f32 %v1895_v48 }
 0x211   :  { %1896 = vrsqrt.f32 %v798_v22  ;;  %vm818_vm7 = vmor %vm816_vm6, %vm817_vm4  ;;  %vm826_vm9 = vweird.f32 %v798_v22 }
 0x212   :  { %v812_v39 = vmul.f32 %v1895_v48, %v811_v42  ;;  %v809_v56 = vsel %vm808_vm5, %v1893_v46, %v805_v63 }
 0x213   :  { %v840_v17 = vmul.f32 %v809_v56, %v2562_v34 }
 0x214   :  { %v813_v29 = vmul.f32 0.5, %v812_v39  ;;  %v791_v33 = vpop.xlane.xlu1 %790 }
 0x215   :  { %v795_v31 = vmul.f32 %v791_v33, %v2558_v13 }
 0x216   :  { %v814_v55 = vsub.f32 1.5, %v813_v29 }
 0x217   :  { %v1897_v54 = vpop.eup %1896  ;;  %v799_v3 = vadd.f32 1e-05, %v795_v31 }
 0x218   :  { %v815_v49 = vmul.f32 %v1895_v48, %v814_v55  ;;  %v821_v61 = vmul.f32 %v1897_v54, %v798_v22  ;;  %vm827_vm8 = vweird.f32 %v1897_v54 }
 0x219   :  { %1898 = vrsqrt.f32 %v799_v3  ;;  %vm828_vm11 = vmor %vm826_vm9, %vm827_vm8  ;;  %vm836_vm12 = vweird.f32 %v799_v3 }
 0x21a   :  { %v819_v32 = vsel %vm818_vm7, %v1895_v48, %v815_v49  ;;  %v822_v26 = vmul.f32 %v1897_v54, %v821_v61  ;;  %v1886_v48 = vld [vmem:[%s3080_s6] ss:$0 sm:$0xff] }
 0x21b   :  { %v841_v60 = vmul.f32 %v819_v32, %v773_v15  ;;  %v3152_v32 = vld [vmem:[#allocation17_spill] sm:$0xff] }
 0x21c   :  { %v823_v59 = vmul.f32 0.5, %v822_v26  ;;  %v3153_v26 = vld [vmem:[#allocation14_spill] sm:$0xff] }
 0x21d   :  { %v844_v50 = vpack.c.bf16 %v841_v60, %v840_v17  ;;  %v3154_v17 = vld [vmem:[#allocation15_spill] sm:$0xff]  ;;  %v3155_v60 = vld [vmem:[#allocation16_spill] sm:$0xff] }
 0x21e   :  { %v824_v27 = vsub.f32 1.5, %v823_v59  ;;  %v3156_v59 = vld [vmem:[#allocation21_spill] sm:$0xff] }
 0x21f   :  { %v1899_v21 = vpop.eup %1898  ;;  %1763 = vmatmul.msk.bf16.vlgmr.msrb.gmra.mxu0 %vm96_vm0, %v844_v50  ;;  %v3157_v50 = vld [vmem:[#allocation18_spill] sm:$0xff] }
 0x220   :  { %v831_v45 = vmul.f32 %v1899_v21, %v799_v3  ;;  %v825_v19 = vmul.f32 %v1897_v54, %v824_v27  ;;  %vm837_vm10 = vweird.f32 %v1899_v21  ;;  %v3159_v27 = vld [vmem:[#allocation20_spill] sm:$0xff] }
 0x221   :  { %vm838_vm13 = vmor %vm836_vm12, %vm837_vm10 }
 0x222   :  { %v832_v24 = vmul.f32 %v1899_v21, %v831_v45  ;;  %v829_v7 = vsel %vm828_vm11, %v1897_v54, %v825_v19  ;;  %v3160_v45 = vld [vmem:[#allocation25_spill] sm:$0xff]  ;;  %v3162_v19 = vld [vmem:[#allocation23_spill] sm:$0xff] }
 0x223   :  { %v842_v15 = vmul.f32 %v829_v7, %v2570_v30  ;;  %v1885_v30 = vld [vmem:[%s3078_s4] ss:$0 sm:$0xff]  ;;  %v3166_v7 = vld [vmem:[#allocation27_spill] sm:$0xff] }
 0x224   :  { %v833_v57 = vmul.f32 0.5, %v832_v24  ;;  %v3161_v24 = vld [vmem:[#allocation22_spill] sm:$0xff] }
 0x226   :  { %v834_v14 = vsub.f32 1.5, %v833_v57  ;;  %v3163_v57 = vld [vmem:[#allocation24_spill] sm:$0xff] }
 0x228   :  { %v835_v28 = vmul.f32 %v1899_v21, %v834_v14  ;;  %v3164_v14 = vld [vmem:[#allocation28_spill] sm:$0xff] }
 0x22a   :  { %v839_v34 = vsel %vm838_vm13, %v1899_v21, %v835_v28  ;;  %v3158_v21 = vld [vmem:[#allocation19_spill] sm:$0xff]  ;;  %v3165_v28 = vld [vmem:[#allocation26_spill] sm:$0xff] }
 0x22b   :  { %v843_v38 = vmul.f32 %v839_v34, %v2576_v58  ;;  %v3167_v34 = vld [vmem:[#allocation5_spill] sm:$0xff] }
 0x22d   :  { %v845_v51 = vpack.c.bf16 %v843_v38, %v842_v15  ;;  %v3168_v15 = vld [vmem:[#allocation31_spill] sm:$0xff]  ;;  %v3169_v38 = vld [vmem:[#allocation29_spill] sm:$0xff] }
 0x22f   :  { %1764 = vmatmul.msk.bf16.gmra.mxu0 %vm96_vm0, %v845_v51  ;;  %v3170_v51 = vld [vmem:[#allocation30_spill] sm:$0xff] }
 0x29c   :  { %v879_v20 = vpop.f32.mrf.mxu0 }
 0x29d   :  { %v880_v40 = vadd.f32 %v1885_v30, %v879_v20 }
 0x29f   :  { %v889_v36 = vmax.f32 %v880_v40, 0.0 }
 0x2a4   :  { %v881_v58 = vpop.f32.mrf.mxu0 }
 0x2a5   :  { %v882_v53 = vadd.f32 %v1885_v30, %v881_v58 }
 0x2a7   :  { %v890_v16 = vmax.f32 %v882_v53, 0.0 }
 0x2a9   :  { %v893_v35 = vpack.c.bf16 %v890_v16, %v889_v36 }
 0x2ab   :  { %1773 = vmatmul.msk.bf16.vlgmr.msra.gmra.mxu1 %vm96_vm0, %v893_v35 }
 0x2ac   :  { %v884_v62 = vpop.f32.mrf.mxu0 }
 0x2ad   :  { %v885_v23 = vadd.f32 %v1885_v30, %v884_v62 }
 0x2af   :  { %v891_v37 = vmax.f32 %v885_v23, 0.0 }
 0x2b4   :  { %v886_v12 = vpop.f32.mrf.mxu0 }
 0x2b5   :  { %v887_v46 = vadd.f32 %v1885_v30, %v886_v12 }
 0x2b7   :  { %v892_v47 = vmax.f32 %v887_v46, 0.0 }
 0x2b9   :  { %v894_v5 = vpack.c.bf16 %v892_v47, %v891_v37 }
 0x2bb   :  { %1774 = vmatmul.msk.bf16.gmra.mxu1 %vm96_vm0, %v894_v5 }
 0x328   :  { %v928_v43 = vpop.f32.mrf.mxu1 }
 0x329   :  { %v929_v39 = vadd.f32 %v1886_v48, %v928_v43 }
 0x32b   :  { %v938_v55 = vmax.f32 %v929_v39, 0.0 }
 0x32d   :  { %v2622_v61 = vadd.f32 %v938_v55, %v2001_v2  ;;  %v3145_v2 = vld [vmem:[#allocation6_spill] sm:$0xff] }
 0x330   :  { %v930_v18 = vpop.f32.mrf.mxu1 }
 0x331   :  { %v931_v25 = vadd.f32 %v1886_v48, %v930_v18 }
 0x333   :  { %v939_v33 = vmax.f32 %v931_v25, 0.0 }
 0x335   :  { %v2617_v56 = vadd.f32 %v939_v33, %v2008_v4  ;;  %v3146_v4 = vld [vmem:[#allocation7_spill] sm:$0xff] }
 0x337   :  { %3143 = vst [vmem:[#allocation34_spill] sm:$0xff] %v2617_v56 }
 0x338   :  { %v933_v44 = vpop.f32.mrf.mxu1 }
 0x339   :  { %v934_v22 = vadd.f32 %v1886_v48, %v933_v44 }
 0x33b   :  { %v940_v63 = vmax.f32 %v934_v22, 0.0 }
 0x33d   :  { %v2611_v54 = vadd.f32 %v940_v63, %v1991_v0  ;;  %v946_v0 = vpack.c.bf16 %v2617_v56, %v2622_v61  ;;  %v1010_v56 = vld [vmem:[%s3076_s2 + $0x268] sm:$0xff] }
 0x33f   :  { %3141 = vst [vmem:[#allocation32_spill] sm:$0xff] %v2611_v54 }
 0x340   :  { %v935_v42 = vpop.f32.mrf.mxu1 }
 0x341   :  { %v936_v29 = vadd.f32 %v1886_v48, %v935_v42 }
 0x343   :  { %v941_v31 = vmax.f32 %v936_v29, 0.0 }
 0x345   :  { %v2614_v3 = vadd.f32 %v941_v31, %v1996_v1  ;;  %v3144_v1 = vld [vmem:[#allocation9_spill] sm:$0xff] }
 0x347   :  { %3142 = vst [vmem:[#allocation33_spill] sm:$0xff] %v2614_v3  ;;  %v947_v49 = vpack.c.bf16 %v2614_v3, %v2611_v54 }
 0x349   :  { %954 = vmatpush.bf16.msrb.mxu2 %v947_v49  ;;  %1051 = vmatpush.bf16.msrb.mxu3 %v947_v49 }
 0x34a   :  { %1148 = vmatpush.bf16.msra.mxu0 %v947_v49  ;;  %1245 = vmatpush.bf16.msrb.mxu1 %v947_v49 }
 0x34d   :  { %955 = vmatpush.bf16.msrb.mxu2 %v946_v0  ;;  %1052 = vmatpush.bf16.msrb.mxu3 %v946_v0 }
 0x34e   :  { %1149 = vmatpush.bf16.msra.mxu0 %v946_v0  ;;  %1246 = vmatpush.bf16.msrb.mxu1 %v946_v0 }
 0x350   :  { %1775 = vmatmul.msk.bf16.vlgmr.msrb.gmra.mxu2 %vm96_vm0, %v2015_v6  ;;  %1783 = vmatmul.msk.bf16.vlgmr.msrb.gmra.mxu3 %vm96_vm0, %v2048_v11  ;;  %v3147_v6 = vld [vmem:[#allocation8_spill] sm:$0xff]  ;;  %v3148_v11 = vld [vmem:[#allocation13_spill] sm:$0xff] }
 0x351   :  { %1791 = vmatmul.msk.bf16.vlgmr.msra.gmra.mxu0 %vm96_vm0, %v2025_v8  ;;  %1799 = vmatmul.msk.bf16.vlgmr.msrb.gmra.mxu1 %vm96_vm0, %v2030_v9  ;;  %v3149_v8 = vld [vmem:[#allocation10_spill] sm:$0xff]  ;;  %v3150_v9 = vld [vmem:[#allocation11_spill] sm:$0xff] }
 0x360   :  { %1776 = vmatmul.msk.bf16.gmra.mxu2 %vm96_vm0, %v2043_v10  ;;  %1784 = vmatmul.msk.bf16.gmra.mxu3 %vm96_vm0, %v3144_v1  ;;  %v3151_v10 = vld [vmem:[#allocation12_spill] sm:$0xff] }
 0x361   :  { %1792 = vmatmul.msk.bf16.gmra.mxu0 %vm96_vm0, %v3145_v2  ;;  %1800 = vmatmul.msk.bf16.gmra.mxu1 %vm96_vm0, %v3146_v4 }
 0x370   :  { %1777 = vmatmul.msk.bf16.gmra.mxu2 %vm96_vm0, %v3147_v6  ;;  %1785 = vmatmul.msk.bf16.gmra.mxu3 %vm96_vm0, %v3148_v11 }
 0x371   :  { %1793 = vmatmul.msk.bf16.gmra.mxu0 %vm96_vm0, %v3149_v8  ;;  %1801 = vmatmul.msk.bf16.gmra.mxu1 %vm96_vm0, %v3150_v9 }
 0x380   :  { %1778 = vmatmul.msk.bf16.gmra.mxu2 %vm96_vm0, %v3151_v10  ;;  %1786 = vmatmul.msk.bf16.gmra.mxu3 %vm96_vm0, %v3152_v32 }
 0x381   :  { %1794 = vmatmul.msk.bf16.gmra.mxu0 %vm96_vm0, %v3153_v26  ;;  %1802 = vmatmul.msk.bf16.gmra.mxu1 %vm96_vm0, %v3154_v17 }
 0x390   :  { %1779 = vmatmul.msk.bf16.gmra.mxu2 %vm96_vm0, %v3155_v60  ;;  %1787 = vmatmul.msk.bf16.gmra.mxu3 %vm96_vm0, %v3156_v59  ;;  %v1001_v60 = vld [vmem:[%s3076_s2 + $0x220] sm:$0xff] }
 0x391   :  { %1795 = vmatmul.msk.bf16.gmra.mxu0 %vm96_vm0, %v3157_v50  ;;  %1803 = vmatmul.msk.bf16.gmra.mxu1 %vm96_vm0, %v3158_v21  ;;  %v997_v21 = vld [vmem:[%s3076_s2 + $0x200] sm:$0xff] }
 0x3a0   :  { %1780 = vmatmul.msk.bf16.gmra.mxu2 %vm96_vm0, %v3159_v27  ;;  %1788 = vmatmul.msk.bf16.gmra.mxu3 %vm96_vm0, %v3160_v45  ;;  %v1005_v27 = vld [vmem:[%s3076_s2 + $0x240] sm:$0xff] }
 0x3a1   :  { %1796 = vmatmul.msk.bf16.gmra.mxu0 %vm96_vm0, %v3161_v24  ;;  %1804 = vmatmul.msk.bf16.gmra.mxu1 %vm96_vm0, %v3162_v19 }
 0x3b0   :  { %1781 = vmatmul.msk.bf16.gmra.mxu2 %vm96_vm0, %v3163_v57  ;;  %1789 = vmatmul.msk.bf16.gmra.mxu3 %vm96_vm0, %v3164_v14  ;;  %v1009_v14 = vld [vmem:[%s3076_s2 + $0x260] sm:$0xff] }
 0x3b1   :  { %1797 = vmatmul.msk.bf16.gmra.mxu0 %vm96_vm0, %v3165_v28  ;;  %1805 = vmatmul.msk.bf16.gmra.mxu1 %vm96_vm0, %v3166_v7 }
 0x3c0   :  { %1782 = vmatmul.msk.bf16.gmra.mxu2 %vm96_vm0, %v3167_v34  ;;  %1790 = vmatmul.msk.bf16.gmra.mxu3 %vm96_vm0, %v3168_v15  ;;  %v1094_v34 = vld [vmem:[%s3076_s2 + $0x280] sm:$0xff]  ;;  %v1002_v15 = vld [vmem:[%s3076_s2 + $0x228] sm:$0xff] }
 0x3c1   :  { %1798 = vmatmul.msk.bf16.gmra.mxu0 %vm96_vm0, %v3169_v38  ;;  %1806 = vmatmul.msk.bf16.gmra.mxu1 %vm96_vm0, %v3170_v51 }
 0x3ce   :  { %v2690_v41 = vpop.f32.mrf.mxu0  ;;  %v2692_v52 = vpop.f32.mrf.mxu1 }
 0x3d3   :  { %v957_v20 = vpop.f32.mrf.mxu2  ;;  %v1054_v30 = vpop.f32.mrf.mxu3 }
 0x3d4   :  { %v1013_v19 = vmul.f32 %v997_v21, %v957_v20  ;;  %v1006_v21 = vld [vmem:[%s3076_s2 + $0x248] sm:$0xff] }
 0x3d6   :  { %v2694_v40 = vpop.f32.mrf.mxu0  ;;  %v2696_v58 = vpop.f32.mrf.mxu1 }
 0x3db   :  { %v2698_v53 = vpop.f32.mrf.mxu2  ;;  %v2700_v36 = vpop.f32.mrf.mxu3 }
 0x3de   :  { %v2702_v16 = vpop.f32.mrf.mxu0  ;;  %v2704_v35 = vpop.f32.mrf.mxu1 }
 0x3e3   :  { %v2706_v62 = vpop.f32.mrf.mxu2  ;;  %v2708_v23 = vpop.f32.mrf.mxu3 }
 0x3e6   :  { %v2710_v12 = vpop.f32.mrf.mxu0  ;;  %v2712_v46 = vpop.f32.mrf.mxu1 }
 0x3eb   :  { %v2714_v37 = vpop.f32.mrf.mxu2  ;;  %v2716_v47 = vpop.f32.mrf.mxu3 }
 0x3ee   :  { %v2718_v5 = vpop.f32.mrf.mxu0  ;;  %v2720_v43 = vpop.f32.mrf.mxu1 }
 0x3f3   :  { %v967_v18 = vpop.f32.mrf.mxu2  ;;  %v1064_v44 = vpop.f32.mrf.mxu3 }
 0x3f4   :  { %v1017_v45 = vmul.f32 %v1001_v60, %v967_v18  ;;  %v1098_v60 = vld [vmem:[%s3076_s2 + $0x2a0] sm:$0xff] }
 0x3f6   :  { %v2722_v48 = vpop.f32.mrf.mxu0  ;;  %v2726_v42 = vpop.f32.mrf.mxu1  ;;  %v1033_v7 = vadd.f32 %v1017_v45, %v1013_v19 }
 0x3fb   :  { %v969_v22 = vpop.f32.mrf.mxu2  ;;  %v2724_v25 = vpop.f32.mrf.mxu3 }
 0x3fc   :  { %v1018_v45 = vmul.f32 %v1002_v15, %v969_v22 }
 0x3fe   :  { %v2728_v39 = vpop.f32.mrf.mxu0  ;;  %v2734_v33 = vpop.f32.mrf.mxu1 }
 0x403   :  { %v2730_v63 = vpop.f32.mrf.mxu2  ;;  %v2732_v29 = vpop.f32.mrf.mxu3 }
 0x406   :  { %v2736_v31 = vpop.f32.mrf.mxu0  ;;  %v2742_v0 = vpop.f32.mrf.mxu1 }
 0x40b   :  { %v2738_v55 = vpop.f32.mrf.mxu2  ;;  %v2740_v49 = vpop.f32.mrf.mxu3 }
 0x40e   :  { %v2744_v1 = vpop.f32.mrf.mxu0  ;;  %v2746_v6 = vpop.f32.mrf.mxu1 }
 0x413   :  { %v977_v2 = vpop.f32.mrf.mxu2  ;;  %v1074_v4 = vpop.f32.mrf.mxu3 }
 0x414   :  { %v1021_v57 = vmul.f32 %v1005_v27, %v977_v2  ;;  %v998_v2 = vld [vmem:[%s3076_s2 + $0x208] sm:$0xff]  ;;  %v1110_v27 = vmul.f32 %v1094_v34, %v1054_v30  ;;  %v1003_v34 = vld [vmem:[%s3076_s2 + $0x230] sm:$0xff] }
 0x416   :  { %v2750_v9 = vpop.f32.mrf.mxu0  ;;  %v2754_v26 = vpop.f32.mrf.mxu1  ;;  %v1037_v18 = vadd.f32 %v1033_v7, %v1021_v57  ;;  %v1102_v57 = vld [vmem:[%s3076_s2 + $0x2c0] sm:$0xff]  ;;  %v1014_v7 = vmul.f32 %v998_v2, %v2698_v53  ;;  %v1095_v53 = vld [vmem:[%s3076_s2 + $0x288] sm:$0xff] }
 0x417   :  { %v1118_v15 = vmul.f32 %v1102_v57, %v1074_v4  ;;  %v1007_v4 = vld [vmem:[%s3076_s2 + $0x250] sm:$0xff] }
 0x418   :  { %v1034_v22 = vadd.f32 %v1018_v45, %v1014_v7  ;;  %v1099_v45 = vld [vmem:[%s3076_s2 + $0x2a8] sm:$0xff] }
 0x41b   :  { %v979_v11 = vpop.f32.mrf.mxu2  ;;  %v2748_v8 = vpop.f32.mrf.mxu3 }
 0x41c   :  { %v1022_v3 = vmul.f32 %v1006_v21, %v979_v11 }
 0x41e   :  { %v2756_v17 = vpop.f32.mrf.mxu0  ;;  %v2771_v24 = vpop.f32.mrf.mxu1  ;;  %v1038_v21 = vadd.f32 %v1034_v22, %v1022_v3 }
 0x423   :  { %v982_v10 = vpop.f32.mrf.mxu2  ;;  %v2752_v32 = vpop.f32.mrf.mxu3 }
 0x424   :  { %v1023_v22 = vmul.f32 %v1007_v4, %v982_v10 }
 0x426   :  { %v2776_v28 = vpop.f32.mrf.mxu0  ;;  %v2803_v30 = vpop.f32.mrf.mxu1 }
 0x42b   :  { %v2761_v59 = vpop.f32.mrf.mxu2  ;;  %v2763_v50 = vpop.f32.mrf.mxu3 }
 0x42e   :  { %v1181_v2 = vpop.f32.mrf.mxu0 }
 0x433   :  { %v987_v38 = vpop.f32.mrf.mxu2  ;;  %v1084_v51 = vpop.f32.mrf.mxu3 }
 0x434   :  { %v1025_v20 = vmul.f32 %v1009_v14, %v987_v38  ;;  %v1106_v14 = vld [vmem:[%s3076_s2 + $0x2e0] sm:$0xff]  ;;  %v1114_v38 = vmul.f32 %v1098_v60, %v1064_v44  ;;  %v999_v60 = vld [vmem:[%s3076_s2 + $0x210] sm:$0xff] }
 0x435   :  { %v1191_v44 = vld [vmem:[%s3076_s2 + $0x300] sm:$0xff] }
 0x436   :  { %v1041_v19 = vadd.f32 %v1037_v18, %v1025_v20  ;;  %v1122_v18 = vmul.f32 %v1106_v14, %v1084_v51  ;;  %v1111_v14 = vmul.f32 %v1095_v53, %v2700_v36  ;;  %v1207_v3 = vmul.f32 %v1191_v44, %v2690_v41  ;;  %v1011_v44 = vld [vmem:[%s3076_s2 + $0x270] sm:$0xff] }
 0x437   :  { %v1115_v36 = vmul.f32 %v1099_v45, %v2724_v25  ;;  %v1192_v25 = vld [vmem:[%s3076_s2 + $0x308] sm:$0xff] }
 0x438   :  { %v1126_v54 = vadd.f32 %v1110_v27, %v1041_v19  ;;  %v1019_v27 = vmul.f32 %v1003_v34, %v2730_v63  ;;  %v1195_v19 = vld [vmem:[%s3076_s2 + $0x320] sm:$0xff]  ;;  %v1015_v63 = vmul.f32 %v999_v60, %v2706_v62  ;;  %v1103_v34 = vld [vmem:[%s3076_s2 + $0x2c8] sm:$0xff] }
 0x439   :  { %v1211_v41 = vmul.f32 %v1195_v19, %v2718_v5  ;;  %v1096_v5 = vld [vmem:[%s3076_s2 + $0x290] sm:$0xff]  ;;  %v1119_v60 = vmul.f32 %v1103_v34, %v2748_v8  ;;  %v1196_v45 = vld [vmem:[%s3076_s2 + $0x328] sm:$0xff]  ;;  %v1208_v34 = vmul.f32 %v1192_v25, %v2694_v40 }
 0x43a   :  { %v1130_v20 = vadd.f32 %v1126_v54, %v1114_v38  ;;  %v1035_v62 = vadd.f32 %v1019_v27, %v1015_v63  ;;  %v1100_v8 = vld [vmem:[%s3076_s2 + $0x2b0] sm:$0xff] }
 0x43b   :  { %v989_v11 = vpop.f32.mrf.mxu2  ;;  %v1086_v57 = vpop.f32.mrf.mxu3 }
 0x43c   :  { %v1026_v54 = vmul.f32 %v1010_v56, %v989_v11  ;;  %v1134_v51 = vadd.f32 %v1130_v20, %v1118_v15  ;;  %v1199_v56 = vld [vmem:[%s3076_s2 + $0x340] sm:$0xff]  ;;  %v1004_v20 = vld [vmem:[%s3076_s2 + $0x238] sm:$0xff]  ;;  %v1107_v11 = vld [vmem:[%s3076_s2 + $0x2e8] sm:$0xff]  ;;  %v1039_v19 = vadd.f32 %v1035_v62, %v1023_v22  ;;  %v1112_v22 = vmul.f32 %v1096_v5, %v2708_v23 }
 0x43d   :  { %v1203_v15 = vld [vmem:[%s3076_s2 + $0x360] sm:$0xff]  ;;  %v1215_v10 = vmul.f32 %v1199_v56, %v2744_v1  ;;  %v1020_v27 = vmul.f32 %v1004_v20, %v2738_v55  ;;  %v1008_v56 = vld [vmem:[%s3076_s2 + $0x258] sm:$0xff]  ;;  %v1116_v62 = vmul.f32 %v1100_v8, %v2732_v29  ;;  %v1108_v5 = vld [vmem:[%s3076_s2 + $0x2f0] sm:$0xff] }
 0x43e   :  { %v1042_v7 = vadd.f32 %v1038_v21, %v1026_v54  ;;  %v1138_v38 = vadd.f32 %v1134_v51, %v1122_v18  ;;  %v1288_v1 = vld [vmem:[%s3076_s2 + $0x380] sm:$0xff]  ;;  %v1219_v4 = vmul.f32 %v1203_v15, %v1181_v2  ;;  %v1000_v51 = vld [vmem:[%s3076_s2 + $0x218] sm:$0xff] }
 0x43f   :  { %v1292_v2 = vld [vmem:[%s3076_s2 + $0x3a0] sm:$0xff]  ;;  %v1304_v15 = vmul.f32 %v1288_v1, %v2692_v52  ;;  %v1016_v20 = vmul.f32 %v1000_v51, %v2714_v37  ;;  %v1097_v51 = vld [vmem:[%s3076_s2 + $0x298] sm:$0xff] }
 0x440   :  { %v1127_v18 = vadd.f32 %v1111_v14, %v1042_v7  ;;  %v1223_v53 = vadd.f32 %v1207_v3, %v1138_v38  ;;  %v1278_v3 = vpop.f32.mrf.mxu1  ;;  %v1123_v7 = vmul.f32 %v1107_v11, %v1086_v57  ;;  %v1296_v57 = vld [vmem:[%s3076_s2 + $0x3c0] sm:$0xff]  ;;  %v1308_v37 = vmul.f32 %v1292_v2, %v2720_v43 }
 0x441   :  { %v1300_v52 = vld [vmem:[%s3076_s2 + $0x3e0] sm:$0xff]  ;;  %v1036_v25 = vadd.f32 %v1020_v27, %v1016_v20  ;;  %v1312_v43 = vmul.f32 %v1296_v57, %v2746_v6  ;;  %v1193_v27 = vld [vmem:[%s3076_s2 + $0x310] sm:$0xff]  ;;  %v1105_v20 = vld [vmem:[%s3076_s2 + $0x2d8] sm:$0xff] }
 0x442   :  { %v1131_v21 = vadd.f32 %v1127_v18, %v1115_v36  ;;  %v1227_v54 = vadd.f32 %v1223_v53, %v1211_v41  ;;  %v1200_v36 = vld [vmem:[%s3076_s2 + $0x348] sm:$0xff]  ;;  %v1183_v41 = vpop.f32.mrf.mxu0  ;;  %v1104_v18 = vld [vmem:[%s3076_s2 + $0x2d0] sm:$0xff] }
 0x443   :  { %v992_v14 = vpop.f32.mrf.mxu2  ;;  %v1089_v11 = vpop.f32.mrf.mxu3  ;;  %v1120_v29 = vmul.f32 %v1104_v18, %v2752_v32  ;;  %v1289_v32 = vld [vmem:[%s3076_s2 + $0x388] sm:$0xff]  ;;  %v1201_v18 = vld [vmem:[%s3076_s2 + $0x350] sm:$0xff] }
 0x444   :  { %v1027_v55 = vmul.f32 %v1011_v44, %v992_v14  ;;  %v1135_v38 = vadd.f32 %v1131_v21, %v1119_v60  ;;  %v1231_v63 = vadd.f32 %v1227_v54, %v1215_v10  ;;  %v1212_v10 = vmul.f32 %v1196_v45, %v2722_v48  ;;  %v1297_v57 = vld [vmem:[%s3076_s2 + $0x3c8] sm:$0xff] }
 0x445   :  { %v1024_v44 = vmul.f32 %v1008_v56, %v2761_v59  ;;  %v1216_v48 = vmul.f32 %v1200_v36, %v2750_v9  ;;  %v1012_v59 = vld [vmem:[%s3076_s2 + $0x278] sm:$0xff]  ;;  %v1316_v54 = vmul.f32 %v1300_v52, %v1278_v3  ;;  %v1124_v9 = vmul.f32 %v1108_v5, %v1089_v11  ;;  %v1197_v56 = vld [vmem:[%s3076_s2 + $0x330] sm:$0xff] }
 0x446   :  { %v1043_v23 = vadd.f32 %v1039_v19, %v1027_v55  ;;  %v1139_v53 = vadd.f32 %v1135_v38, %v1123_v7  ;;  %v1235_v40 = vadd.f32 %v1231_v63, %v1219_v4  ;;  %v1204_v4 = vld [vmem:[%s3076_s2 + $0x368] sm:$0xff]  ;;  %v1101_v3 = vld [vmem:[%s3076_s2 + $0x2b8] sm:$0xff]  ;;  %v1305_v36 = vmul.f32 %v1289_v32, %v2696_v58 }
 0x447   :  { %v1040_v14 = vadd.f32 %v1036_v25, %v1024_v44  ;;  %v1220_v2 = vmul.f32 %v1204_v4, %v1183_v41  ;;  %v1293_v55 = vld [vmem:[%s3076_s2 + $0x3a8] sm:$0xff]  ;;  %v1117_v58 = vmul.f32 %v1101_v3, %v2740_v49  ;;  %v1121_v49 = vmul.f32 %v1105_v20, %v2763_v50  ;;  %v1202_v3 = vld [vmem:[%s3076_s2 + $0x358] sm:$0xff] }
 0x448   :  { %v1128_v1 = vadd.f32 %v1112_v22, %v1043_v23  ;;  %v1224_v60 = vadd.f32 %v1208_v34, %v1139_v53  ;;  %v1320_v21 = vadd.f32 %v1304_v15, %v1235_v40  ;;  %v1113_v34 = vmul.f32 %v1097_v51, %v2716_v47  ;;  %v1280_v41 = vpop.f32.mrf.mxu1  ;;  %v1301_v25 = vld [vmem:[%s3076_s2 + $0x3e8] sm:$0xff] }
 0x449   :  { %v1209_v15 = vmul.f32 %v1193_v27, %v2702_v16  ;;  %v1213_v16 = vmul.f32 %v1197_v56, %v2728_v39  ;;  %v1309_v52 = vmul.f32 %v1293_v55, %v2726_v42  ;;  %v1217_v39 = vmul.f32 %v1201_v18, %v2756_v17  ;;  %v1194_v17 = vld [vmem:[%s3076_s2 + $0x318] sm:$0xff]  ;;  %v1302_v56 = vld [vmem:[%s3076_s2 + $0x3f0] sm:$0xff] }
 0x44a   :  { %v1132_v45 = vadd.f32 %v1128_v1, %v1116_v62  ;;  %v1228_v6 = vadd.f32 %v1224_v60, %v1212_v10  ;;  %v1324_v19 = vadd.f32 %v1320_v21, %v1308_v37  ;;  %v1186_v62 = vpop.f32.mrf.mxu0  ;;  %v1205_v10 = vld [vmem:[%s3076_s2 + $0x370] sm:$0xff]  ;;  %v1313_v42 = vmul.f32 %v1297_v57, %v2754_v26  ;;  %v1109_v60 = vld [vmem:[%s3076_s2 + $0x2f8] sm:$0xff] }
 0x44b   :  { %v994_v8 = vpop.f32.mrf.mxu2  ;;  %v1091_v1 = vpop.f32.mrf.mxu3  ;;  %v1290_v21 = vld [vmem:[%s3076_s2 + $0x390] sm:$0xff]  ;;  %v1317_v50 = vmul.f32 %v1301_v25, %v1280_v41 }
 0x44c   :  { %v1028_v7 = vmul.f32 %v1012_v59, %v994_v8  ;;  %v1136_v38 = vadd.f32 %v1132_v45, %v1120_v29  ;;  %v1232_v63 = vadd.f32 %v1228_v6, %v1216_v48  ;;  %v1328_v22 = vadd.f32 %v1324_v19, %v1312_v43  ;;  %v1294_v26 = vld [vmem:[%s3076_s2 + $0x3b0] sm:$0xff] }
 0x44d   :  { %v1221_v29 = vmul.f32 %v1205_v10, %v1186_v62  ;;  %v1125_v59 = vmul.f32 %v1109_v60, %v1091_v1  ;;  %v1306_v32 = vmul.f32 %v1290_v21, %v2704_v35  ;;  %v1210_v45 = vmul.f32 %v1194_v17, %v2710_v12  ;;  %v1298_v6 = vld [vmem:[%s3076_s2 + $0x3d0] sm:$0xff]  ;;  %v1303_v10 = vld [vmem:[%s3076_s2 + $0x3f8] sm:$0xff] }
 0x44e   :  { %v1044_v23 = vadd.f32 %v1040_v14, %v1028_v7  ;;  %v1140_v53 = vadd.f32 %v1136_v38, %v1124_v9  ;;  %v1236_v47 = vadd.f32 %v1232_v63, %v1220_v2  ;;  %v2939_v40 = vadd.f32 %v1328_v22, %v1316_v54  ;;  %v1198_v9 = vld [vmem:[%s3076_s2 + $0x338] sm:$0xff] }
 0x44f   :  { %v1310_v2 = vmul.f32 %v1294_v26, %v2734_v33  ;;  %v1214_v12 = vmul.f32 %v1198_v9, %v2736_v31  ;;  %v1314_v63 = vmul.f32 %v1298_v6, %v2771_v24  ;;  %v1206_v33 = vld [vmem:[%s3076_s2 + $0x378] sm:$0xff]  ;;  %v1873_v9 = vld [vmem:[%s3077_s3 + $0x10] sm:$0xff] }
 0x450   :  { %v1129_v37 = vadd.f32 %v1113_v34, %v1044_v23  ;;  %v1225_v44 = vadd.f32 %v1209_v15, %v1140_v53  ;;  %v1321_v11 = vadd.f32 %v1305_v36, %v1236_v47  ;;  %v1336_v5 = vsel %vm96_vm0, %v2939_v40, 0.0  ;;  %v1283_v35 = vpop.f32.mrf.mxu1  ;;  %v1291_v31 = vld [vmem:[%s3076_s2 + $0x398] sm:$0xff] }
 0x451   :  { %1337 = vadd.xlane.f32.xlu2 %v1336_v5  ;;  %v1218_v34 = vmul.f32 %v1202_v3, %v2776_v28  ;;  %v1318_v36 = vmul.f32 %v1302_v56, %v1283_v35  ;;  %v1295_v24 = vld [vmem:[%s3076_s2 + $0x3b8] sm:$0xff]  ;;  %v1307_v23 = vmul.f32 %v1291_v31, %v2712_v46 }
 0x452   :  { %v1133_v4 = vadd.f32 %v1129_v37, %v1117_v58  ;;  %v1229_v48 = vadd.f32 %v1225_v44, %v1213_v16  ;;  %v1325_v43 = vadd.f32 %v1321_v11, %v1309_v52  ;;  %v1188_v22 = vpop.f32.mrf.mxu0  ;;  %v1299_v28 = vld [vmem:[%s3076_s2 + $0x3d8] sm:$0xff]  ;;  %v1311_v58 = vmul.f32 %v1295_v24, %v2742_v0 }
 0x453   :  { %v1222_v20 = vmul.f32 %v1206_v33, %v1188_v22  ;;  %v1315_v37 = vmul.f32 %v1299_v28, %v2803_v30 }
 0x454   :  { %v1137_v54 = vadd.f32 %v1133_v4, %v1121_v49  ;;  %v1233_v51 = vadd.f32 %v1229_v48, %v1217_v39  ;;  %v1329_v27 = vadd.f32 %v1325_v43, %v1313_v42 }
 0x456   :  { %v1141_v19 = vadd.f32 %v1137_v54, %v1125_v59  ;;  %v1237_v14 = vadd.f32 %v1233_v51, %v1221_v29  ;;  %v1333_v8 = vadd.f32 %v1329_v27, %v1317_v50 }
 0x458   :  { %v1226_v55 = vadd.f32 %v1210_v45, %v1141_v19  ;;  %v1322_v7 = vadd.f32 %v1306_v32, %v1237_v14  ;;  %v1339_v38 = vsel %vm96_vm0, %v1333_v8, 0.0  ;;  %v1285_v62 = vpop.f32.mrf.mxu1  ;;  %v1874_v32 = vld [vmem:[%s3077_s3 + $0x18] sm:$0xff] }
 0x459   :  { %1340 = vadd.xlane.f32.xlu0 %v1339_v38  ;;  %v1319_v44 = vmul.f32 %v1303_v10, %v1285_v62  ;;  %1456 = vmatpush.bf16.msra.mxu2 %v1874_v32 }
 0x45a   :  { %v1230_v15 = vadd.f32 %v1226_v55, %v1214_v12  ;;  %v1326_v41 = vadd.f32 %v1322_v7, %v1310_v2 }
 0x45c   :  { %v1234_v18 = vadd.f32 %v1230_v15, %v1218_v34  ;;  %v1330_v57 = vadd.f32 %v1326_v41, %v1314_v63 }
 0x45d   :  { %1457 = vmatpush.bf16.msra.mxu2 %v1873_v9 }
 0x45e   :  { %v1238_v53 = vadd.f32 %v1234_v18, %v1222_v20  ;;  %v1334_v47 = vadd.f32 %v1330_v57, %v1318_v36 }
 0x460   :  { %v1323_v16 = vadd.f32 %v1307_v23, %v1238_v53  ;;  %v1342_v52 = vsel %vm96_vm0, %v1334_v47, 0.0 }
 0x461   :  { %1343 = vadd.xlane.f32.xlu1 %v1342_v52 }
 0x462   :  { %v1327_v46 = vadd.f32 %v1323_v16, %v1311_v58 }
 0x464   :  { %v1331_v11 = vadd.f32 %v1327_v46, %v1315_v37 }
 0x466   :  { %v1335_v5 = vadd.f32 %v1331_v11, %v1319_v44 }
 0x468   :  { %v1345_v25 = vsel %vm96_vm0, %v1335_v5, 0.0 }
 0x469   :  { %1346 = vadd.xlane.f32.xlu2 %v1345_v25 }
 0x4c4   :  { %v1338_v49 = vpop.xlane.xlu2 %1337 }
 0x4c5   :  { %v1348_v0 = vmul.f32 %v1338_v49, %v2558_v13 }
 0x4c7   :  { %v3008_v39 = vsub.f32 %v2939_v40, %v1348_v0 }
 0x4c9   :  { %v1356_v42 = vmul.f32 %v3008_v39, %v3008_v39 }
 0x4cb   :  { %v1360_v1 = vsel %vm96_vm0, %v1356_v42, 0.0 }
 0x4cc   :  { %1361 = vadd.xlane.f32.xlu0 %v1360_v1  ;;  %v1341_v30 = vpop.xlane.xlu0 %1340 }
 0x4cd   :  { %v1349_v60 = vmul.f32 %v1341_v30, %v2558_v13  ;;  %v1876_v30 = vld [vmem:[%s3079_s5 + $0x18] sm:$0xff] }
 0x4ce   :  { %1505 = vmatpush.bf16.msra.mxu3 %v1876_v30 }
 0x4cf   :  { %v1353_v21 = vsub.f32 %v1333_v8, %v1349_v60  ;;  %v1875_v60 = vld [vmem:[%s3079_s5 + $0x10] sm:$0xff] }
 0x4d1   :  { %v1357_v4 = vmul.f32 %v1353_v21, %v1353_v21 }
 0x4d2   :  { %1506 = vmatpush.bf16.msra.mxu3 %v1875_v60 }
 0x4d3   :  { %v1363_v29 = vsel %vm96_vm0, %v1357_v4, 0.0  ;;  %v1887_v4 = vld [vmem:[%s3078_s4 + $0x1] ss:$0 sm:$0xff] }
 0x4d4   :  { %1364 = vadd.xlane.f32.xlu1 %v1363_v29  ;;  %v1344_v48 = vpop.xlane.xlu1 %1343 }
 0x4d5   :  { %v1350_v43 = vmul.f32 %v1344_v48, %v2558_v13 }
 0x4d7   :  { %v3016_v17 = vsub.f32 %v1334_v47, %v1350_v43 }
 0x4d9   :  { %v1358_v40 = vmul.f32 %v3016_v17, %v3016_v17 }
 0x4db   :  { %v1366_v50 = vsel %vm96_vm0, %v1358_v40, 0.0 }
 0x4dc   :  { %1367 = vadd.xlane.f32.xlu2 %v1366_v50  ;;  %v1347_v26 = vpop.xlane.xlu2 %1346 }
 0x4dd   :  { %v1351_v59 = vmul.f32 %v1347_v26, %v2558_v13 }
 0x4df   :  { %v3022_v54 = vsub.f32 %v1335_v5, %v1351_v59 }
 0x4e1   :  { %v1359_v51 = vmul.f32 %v3022_v54, %v3022_v54 }
 0x4e3   :  { %v1369_v27 = vsel %vm96_vm0, %v1359_v51, 0.0 }
 0x4e4   :  { %1370 = vadd.xlane.f32.xlu0 %v1369_v27 }
 0x53f   :  { %v1362_v45 = vpop.xlane.xlu0 %1361 }
 0x540   :  { %v1372_v6 = vmul.f32 %v1362_v45, %v2558_v13  ;;  %v1878_v45 = vld [vmem:[%s3081_s7 + $0x8] sm:$0xff] }
 0x541   :  { %1560 = vmatpush.bf16.msrb.mxu0 %v1878_v45 }
 0x542   :  { %v1376_v19 = vadd.f32 1e-05, %v1372_v6  ;;  %v1877_v6 = vld [vmem:[%s3081_s7] sm:$0xff] }
 0x544   :  { %1900 = vrsqrt.f32 %v1376_v19  ;;  %vm1386_vm15 = vweird.f32 %v1376_v19 }
 0x545   :  { %1561 = vmatpush.bf16.msrb.mxu0 %v1877_v6 }
 0x547   :  { %v1365_v14 = vpop.xlane.xlu1 %1364 }
 0x548   :  { %v1373_v8 = vmul.f32 %v1365_v14, %v2558_v13  ;;  %v1888_v14 = vld [vmem:[%s3080_s6 + $0x1] ss:$0 sm:$0xff] }
 0x54a   :  { %v1901_v2 = vpop.eup %1900  ;;  %v1377_v3 = vadd.f32 1e-05, %v1373_v8 }
 0x54b   :  { %v1381_v35 = vmul.f32 %v1901_v2, %v1376_v19  ;;  %vm1387_vm14 = vweird.f32 %v1901_v2 }
 0x54c   :  { %1902 = vrsqrt.f32 %v1377_v3  ;;  %vm1388_vm2 = vmor %vm1386_vm15, %vm1387_vm14  ;;  %vm1396_vm3 = vweird.f32 %v1377_v3 }
 0x54d   :  { %v1382_v56 = vmul.f32 %v1901_v2, %v1381_v35 }
 0x54f   :  { %v1383_v12 = vmul.f32 0.5, %v1382_v56  ;;  %v1368_v55 = vpop.xlane.xlu2 %1367 }
 0x550   :  { %v1374_v7 = vmul.f32 %v1368_v55, %v2558_v13  ;;  %v3171_v55 = vld [vmem:[#allocation34_spill] sm:$0xff] }
 0x551   :  { %v1384_v22 = vsub.f32 1.5, %v1383_v12 }
 0x552   :  { %v1903_v38 = vpop.eup %1902  ;;  %v1378_v63 = vadd.f32 1e-05, %v1374_v7 }
 0x553   :  { %v1391_v33 = vmul.f32 %v1903_v38, %v1377_v3  ;;  %v1385_v15 = vmul.f32 %v1901_v2, %v1384_v22  ;;  %vm1397_vm1 = vweird.f32 %v1903_v38 }
 0x554   :  { %1904 = vrsqrt.f32 %v1378_v63  ;;  %vm1398_vm4 = vmor %vm1396_vm3, %vm1397_vm1  ;;  %vm1406_vm6 = vweird.f32 %v1378_v63 }
 0x555   :  { %v1392_v34 = vmul.f32 %v1903_v38, %v1391_v33  ;;  %v1389_v24 = vsel %vm1388_vm2, %v1901_v2, %v1385_v15 }
 0x556   :  { %v1420_v58 = vmul.f32 %v1389_v24, %v3008_v39 }
 0x557   :  { %v1393_v36 = vmul.f32 0.5, %v1392_v34  ;;  %v1371_v41 = vpop.xlane.xlu0 %1370 }
 0x558   :  { %v1375_v31 = vmul.f32 %v1371_v41, %v2558_v13  ;;  %v3172_v41 = vld [vmem:[#allocation32_spill] sm:$0xff] }
 0x559   :  { %v1394_v20 = vsub.f32 1.5, %v1393_v36 }
 0x55a   :  { %v1905_v18 = vpop.eup %1904  ;;  %v1379_v57 = vadd.f32 1e-05, %v1375_v31 }
 0x55b   :  { %v1395_v23 = vmul.f32 %v1903_v38, %v1394_v20  ;;  %v1401_v53 = vmul.f32 %v1905_v18, %v1378_v63  ;;  %vm1407_vm5 = vweird.f32 %v1905_v18  ;;  %v3173_v20 = vld [vmem:[#allocation33_spill] sm:$0xff] }
 0x55c   :  { %1906 = vrsqrt.f32 %v1379_v57  ;;  %vm1408_vm8 = vmor %vm1406_vm6, %vm1407_vm5  ;;  %vm1416_vm9 = vweird.f32 %v1379_v57 }
 0x55d   :  { %v1399_v47 = vsel %vm1398_vm4, %v1903_v38, %v1395_v23  ;;  %v1402_v28 = vmul.f32 %v1905_v18, %v1401_v53 }
 0x55e   :  { %v1421_v16 = vmul.f32 %v1399_v47, %v1353_v21 }
 0x55f   :  { %v1403_v52 = vmul.f32 0.5, %v1402_v28 }
 0x560   :  { %v1424_v62 = vpack.c.bf16 %v1421_v16, %v1420_v58 }
 0x561   :  { %v1404_v10 = vsub.f32 1.5, %v1403_v52 }
 0x562   :  { %v1907_v13 = vpop.eup %1906  ;;  %1815 = vmatmul.msk.bf16.vlgmr.msra.gmra.mxu2 %vm96_vm0, %v1424_v62 }
 0x563   :  { %v1411_v37 = vmul.f32 %v1907_v13, %v1379_v57  ;;  %v1405_v44 = vmul.f32 %v1905_v18, %v1404_v10  ;;  %vm1417_vm7 = vweird.f32 %v1907_v13 }
 0x564   :  { %vm1418_vm10 = vmor %vm1416_vm9, %vm1417_vm7 }
 0x565   :  { %v1412_v46 = vmul.f32 %v1907_v13, %v1411_v37  ;;  %v1409_v25 = vsel %vm1408_vm8, %v1905_v18, %v1405_v44 }
 0x566   :  { %v1422_v39 = vmul.f32 %v1409_v25, %v3016_v17 }
 0x567   :  { %v1413_v11 = vmul.f32 0.5, %v1412_v46 }
 0x569   :  { %v1414_v5 = vsub.f32 1.5, %v1413_v11 }
 0x56b   :  { %v1415_v49 = vmul.f32 %v1907_v13, %v1414_v5 }
 0x56d   :  { %v1419_v0 = vsel %vm1418_vm10, %v1907_v13, %v1415_v49 }
 0x56e   :  { %v1423_v42 = vmul.f32 %v1419_v0, %v3022_v54 }
 0x570   :  { %v1425_v1 = vpack.c.bf16 %v1423_v42, %v1422_v39 }
 0x572   :  { %1816 = vmatmul.msk.bf16.gmra.mxu2 %vm96_vm0, %v1425_v1 }
 0x5e5   :  { %v1459_v21 = vpop.f32.mrf.mxu2 }
 0x5e6   :  { %v1460_v29 = vadd.f32 %v1887_v4, %v1459_v21 }
 0x5e8   :  { %v1469_v17 = vmax.f32 %v1460_v29, 0.0 }
 0x5ed   :  { %v1461_v48 = vpop.f32.mrf.mxu2 }
 0x5ee   :  { %v1462_v43 = vadd.f32 %v1887_v4, %v1461_v48 }
 0x5f0   :  { %v1470_v40 = vmax.f32 %v1462_v43, 0.0 }
 0x5f2   :  { %v1473_v50 = vpack.c.bf16 %v1470_v40, %v1469_v17 }
 0x5f4   :  { %1825 = vmatmul.msk.bf16.vlgmr.msra.gmra.mxu3 %vm96_vm0, %v1473_v50 }
 0x5f5   :  { %v1464_v26 = vpop.f32.mrf.mxu2 }
 0x5f6   :  { %v1465_v59 = vadd.f32 %v1887_v4, %v1464_v26 }
 0x5f8   :  { %v1471_v27 = vmax.f32 %v1465_v59, 0.0 }
 0x5fd   :  { %v1466_v54 = vpop.f32.mrf.mxu2 }
 0x5fe   :  { %v1467_v51 = vadd.f32 %v1887_v4, %v1466_v54 }
 0x600   :  { %v1472_v32 = vmax.f32 %v1467_v51, 0.0 }
 0x602   :  { %v1474_v9 = vpack.c.bf16 %v1472_v32, %v1471_v27 }
 0x604   :  { %1826 = vmatmul.msk.bf16.gmra.mxu3 %vm96_vm0, %v1474_v9 }
 0x677   :  { %v1508_v19 = vpop.f32.mrf.mxu3 }
 0x678   :  { %v1509_v8 = vadd.f32 %v1888_v14, %v1508_v19 }
 0x67a   :  { %v1518_v3 = vmax.f32 %v1509_v8, 0.0 }
 0x67c   :  { %v1522_v12 = vadd.f32 %v1518_v3, %v2622_v61  ;;  %v1889_v61 = vld [vmem:[%s3082_s8] ss:$0 sm:$0xff]  ;;  %s1936_s8 = smov 128  }
 0x67f   :  { %v1510_v2 = vpop.f32.mrf.mxu3 }
 0x680   :  { %v1511_v35 = vadd.f32 %v1888_v14, %v1510_v2 }
 0x682   :  { %v1519_v56 = vmax.f32 %v1511_v35, 0.0 }
 0x684   :  { %v1523_v7 = vadd.f32 %v1519_v56, %v3171_v55 }
 0x686   :  { %v1526_v38 = vpack.c.bf16 %v1523_v7, %v1522_v12 }
 0x687   :  { %v1513_v63 = vpop.f32.mrf.mxu3 }
 0x688   :  { %1835 = vmatmul.msk.bf16.vlgmr.msrb.gmra.mxu0 %vm96_vm0, %v1526_v38  ;;  %v1514_v22 = vadd.f32 %v1888_v14, %v1513_v63 }
 0x68a   :  { %v1520_v34 = vmax.f32 %v1514_v22, 0.0 }
 0x68c   :  { %v1524_v31 = vadd.f32 %v1520_v34, %v3172_v41 }
 0x68f   :  { %v1515_v33 = vpop.f32.mrf.mxu3 }
 0x690   :  { %v1516_v15 = vadd.f32 %v1888_v14, %v1515_v33 }
 0x692   :  { %v1521_v36 = vmax.f32 %v1516_v15, 0.0 }
 0x694   :  { %v1525_v18 = vadd.f32 %v1521_v36, %v3173_v20 }
 0x696   :  { %v1527_v57 = vpack.c.bf16 %v1525_v18, %v1524_v31 }
 0x698   :  { %1836 = vmatmul.msk.bf16.gmra.mxu0 %vm96_vm0, %v1527_v57 }
 0x705   :  { %v1563_v24 = vpop.f32.mrf.mxu0 }
 0x706   :  { %v1564_v23 = vadd.f32 %v1889_v61, %v1563_v24 }
 0x708   :  { %1573 = vst [vmem:[#allocation2] sm:$0xff] %v1564_v23 }
 0x70d   :  { %v1565_v53 = vpop.f32.mrf.mxu0 }
 0x70e   :  { %v1566_v47 = vadd.f32 %v1889_v61, %v1565_v53 }
 0x710   :  { %1574 = vst [vmem:[#allocation2 + $0x8] sm:$0xff] %v1566_v47 }
 0x715   :  { %v1568_v28 = vpop.f32.mrf.mxu0 }
 0x716   :  { %v1569_v58 = vadd.f32 %v1889_v61, %v1568_v28 }
 0x718   :  { %1575 = vst [vmem:[#allocation2 + $0x10] sm:$0xff] %v1569_v58 }
 0x71d   :  { %v1570_v16 = vpop.f32.mrf.mxu0 }
 0x71e   :  { %v1571_v52 = vadd.f32 %v1889_v61, %v1570_v16 }
 0x720   :  { %1576 = vst [vmem:[#allocation2 + $0x18] sm:$0xff] %v1571_v52 }
 0x721   :  { %1589 = dma.vmem_to_hbm [thread:$0]  %s1582_s19, 512, %s1584_s21, [#allocation3], %s1936_s8, %s1936_s8, %s1937_s22  }
 0x722   :  { %1932 = dma.done.wait [#allocation3], 512  }
 0x723   :  { %1933 = vsyncadd [#allocation3], 4294966784 }
 0x724   :  { %1594 = vsyncpa [#allocation3], 1 }

</bundles_post_ra>
